<compile_context>
chip_gen: v7x
topology: tpu7x:2x2x1
jax: 0.10.0
libtpu: 0.0.40
codegen_flags: <defaults>
</compile_context>

<pallas_src>
import jax
import jax.numpy as jnp
from jax.experimental import pallas as pl
from jax.experimental.pallas import tpu as pltpu


# ----------------------------- Pallas kernels -----------------------------

def _gates_input_gemm_kernel(x_ref, w_ref, b_ref, gi_ref):
    # x: (N, E), w: (3, E, H), b: (3, 1, H) -> gi: (3, N, H). One big MXU gemm per gate.
    x = x_ref[...]
    w = w_ref[...]
    b = b_ref[...]
    for g in range(3):
        gi_ref[g] = jnp.dot(x, w[g], preferred_element_type=jnp.float32) + b[g]


def _enc_recurrence_kernel(gi_ref, whh_ref, bhh_ref, out_ref, h_ref):
    # grid=(S,). gi block: (3, 1, B, H) for step s (input-side gemm precomputed, bias folded in).
    # whh: (3, H, H), bhh: (3, 1, H) resident; h_ref: (B, H) VMEM scratch carried across steps.
    s = pl.program_id(0)

    @pl.when(s == 0)
    def _init():
        h_ref[...] = jnp.zeros_like(h_ref)

    h = h_ref[...]
    gi = gi_ref[...]            # (3, 1, B, H)
    whh = whh_ref[...]          # (3, H, H)
    bhh = bhh_ref[...]          # (3, 1, H)

    gh_r = jnp.dot(h, whh[0], preferred_element_type=jnp.float32) + bhh[0]
    gh_z = jnp.dot(h, whh[1], preferred_element_type=jnp.float32) + bhh[1]
    gh_n = jnp.dot(h, whh[2], preferred_element_type=jnp.float32) + bhh[2]

    r = jax.nn.sigmoid(gi[0, 0] + gh_r)
    z = jax.nn.sigmoid(gi[1, 0] + gh_z)
    n = jnp.tanh(gi[2, 0] + r * gh_n)
    h_new = (1.0 - z) * n + z * h

    h_ref[...] = h_new
    out_ref[0] = h_new


def _decoder_step_kernel(coin_ref,                       # SMEM scalar-prefetch: (T-1,) int32
                         temb_ref, enc_ref, trgtab_ref,
                         wih_e_ref, wih_c_ref, whh_ref, b_rz_ref, b_n_ref,
                         bridge_w_ref, bridge_b_ref,
                         out_wh_ref, out_wc_ref, out_b_ref,
                         out_ref, h_ref, gemb_ref):
    # grid=(T-1,), sequential. enc: (B, S, Henc) resident. Scratch: h (B, Hdec), gemb (B, Etok).
    i = pl.program_id(0)
    S = enc_ref.shape[1]
    enc = enc_ref[...]                               # (B, S, Henc)

    @pl.when(i == 0)
    def _init():
        # bridge: decoder h0 = tanh(Linear(encoder final hidden)) -- fused into step 0.
        enc_last = enc[:, S - 1, :]                  # (B, Henc) == final encoder hidden
        h_ref[...] = jnp.tanh(
            jnp.dot(enc_last, bridge_w_ref[...], preferred_element_type=jnp.float32)
            + bridge_b_ref[...])
        gemb_ref[...] = jnp.zeros_like(gemb_ref)

    h = h_ref[...]                                   # (B, Hdec)

    # ---- input-token embedding: teacher (precomputed) vs greedy feedback (scratch) ----
    sel = (coin_ref[i] == 1).astype(jnp.float32)
    emb = sel * temb_ref[0] + (1.0 - sel) * gemb_ref[...]      # (B, Etok)

    # ---- dot attention on the MXU (batched einsum over B, contracting H) ----
    scores = jnp.einsum('bqh,bsh->bqs', h[:, None, :], enc,
                        preferred_element_type=jnp.float32)    # (B, 1, S)
    m = jnp.max(scores, axis=-1, keepdims=True)
    e = jnp.exp(scores - m)
    attn = e * pl.reciprocal(jnp.sum(e, axis=-1, keepdims=True), approx=True)
    ctx = jnp.einsum('bqs,bsh->bqh', attn, enc,
                     preferred_element_type=jnp.float32)[:, 0, :]   # (B, Henc)

    # ---- GRU cell: gate-split weights, lane-aligned; concat avoided by splitting wih ----
    wih_e = wih_e_ref[...]                           # (3, Etok, Hdec)
    wih_c = wih_c_ref[...]                           # (3, Henc, Hdec)
    whh = whh_ref[...]                               # (3, Hdec, Hdec)
    b_rz = b_rz_ref[...]                             # (2, 1, Hdec)  (bih+bhh folded for r, z)
    b_n = b_n_ref[...]                               # (2, 1, Hdec)  (b_in, b_hn)

    def gate_in(g):
        return (jnp.dot(emb, wih_e[g], preferred_element_type=jnp.float32)
                + jnp.dot(ctx, wih_c[g], preferred_element_type=jnp.float32))

    def gate_hid(g):
        return jnp.dot(h, whh[g], preferred_element_type=jnp.float32)

    r = jax.nn.sigmoid(gate_in(0) + gate_hid(0) + b_rz[0])
    z = jax.nn.sigmoid(gate_in(1) + gate_hid(1) + b_rz[1])
    n = jnp.tanh(gate_in(2) + b_n[0] + r * (gate_hid(2) + b_n[1]))
    h_new = (1.0 - z) * n + z * h
    h_ref[...] = h_new

    # ---- vocab projection (+bias) + log-softmax; out_w split so no lane concat is needed ----
    logits = (jnp.dot(h_new, out_wh_ref[...], preferred_element_type=jnp.float32)
              + jnp.dot(ctx, out_wc_ref[...], preferred_element_type=jnp.float32)
              + out_b_ref[...])                      # (B, V)
    mx = jnp.max(logits, axis=-1, keepdims=True)
    sh = logits - mx
    lse = jnp.log(jnp.sum(jnp.exp(sh), axis=-1, keepdims=True))
    out_ref[0] = sh - lse

    # ---- greedy (first-argmax) embedding for the next step's non-teacher path ----
    V = logits.shape[-1]
    lane = jax.lax.broadcasted_iota(jnp.int32, logits.shape, 1)
    first_idx = jnp.min(jnp.where(logits == mx, lane, V), axis=-1, keepdims=True)
    onehot = (lane == first_idx).astype(jnp.float32)            # (B, V)
    gemb_ref[...] = jnp.dot(onehot, trgtab_ref[...], preferred_element_type=jnp.float32)


# ----------------------------- pallas_call wrappers -----------------------------

_VMEM_FULL = pl.BlockSpec(memory_space=pltpu.MemorySpace.VMEM)


def gates_input_gemm(x2, w3, b3):
    # x2: (N, E), w3: (3, E, H), b3: (3, 1, H) -> (3, N, H)
    N = x2.shape[0]
    H = w3.shape[-1]
    return pl.pallas_call(
        _gates_input_gemm_kernel,
        out_shape=jax.ShapeDtypeStruct((3, N, H), jnp.float32),
        in_specs=[_VMEM_FULL, _VMEM_FULL, _VMEM_FULL],
        out_specs=_VMEM_FULL,
    )(x2, w3, b3)


def enc_recurrence(gi, whh, bhh):
    # gi: (3, S, B, H), whh: (3, H, H), bhh: (3, 1, H) -> enc_out (S, B, H)
    _, S, B, H = gi.shape
    grid_spec = pltpu.PrefetchScalarGridSpec(
        num_scalar_prefetch=0,
        grid=(S,),
        in_specs=[
            pl.BlockSpec((3, 1, B, H), lambda s: (0, s, 0, 0)),   # per-step input gates
            pl.BlockSpec((3, H, H), lambda s: (0, 0, 0)),         # resident
            pl.BlockSpec((3, 1, H), lambda s: (0, 0, 0)),         # resident
        ],
        out_specs=pl.BlockSpec((1, B, H), lambda s: (s, 0, 0)),
        scratch_shapes=[pltpu.VMEM((B, H), jnp.float32)],
    )
    return pl.pallas_call(
        _enc_recurrence_kernel,
        out_shape=jax.ShapeDtypeStruct((S, B, H), jnp.float32),
        grid_spec=grid_spec,
        compiler_params=pltpu.CompilerParams(dimension_semantics=("arbitrary",)),
    )(gi, whh, bhh)


def decoder_run(p, trg, enc_bsh, coin):
    # trg: (T, B) int32 (padded batch), enc_bsh: (B, S, Henc), coin: (T-1,) int32
    n_steps = trg.shape[0] - 1
    B, S, Henc = enc_bsh.shape
    Hdec = p["dec_whh"].shape[-1]
    V, Etok = p["trg_embed"].shape

    temb = p["trg_embed"][trg[:n_steps]]                        # (T-1, B, Etok) teacher path
    b_rz = p["dec_bih"][:2] + p["dec_bhh"][:2]                  # fold r/z biases
    b_n = jnp.stack([p["dec_bih"][2], p["dec_bhh"][2]], axis=0)  # (b_in, b_hn)

    def resident(shape):
        n = len(shape)
        return pl.BlockSpec(shape, lambda i, c, n=n: (0,) * n)

    grid_spec = pltpu.PrefetchScalarGridSpec(
        num_scalar_prefetch=1,                                   # coin -> SMEM
        grid=(n_steps,),
        in_specs=[
            pl.BlockSpec((1, B, Etok), lambda i, c: (i, 0, 0)),  # teacher embeddings (per step)
            resident((B, S, Henc)),                              # encoder outputs (resident)
            resident((V, Etok)),                                 # trg embedding table
            resident((3, Etok, Hdec)),                           # dec_wih (embed part)
            resident((3, Henc, Hdec)),                           # dec_wih (context part)
            resident((3, Hdec, Hdec)),                           # dec_whh
            resident((2, 1, Hdec)),                              # folded r/z bias
            resident((2, 1, Hdec)),                              # (b_in, b_hn)
            resident((Henc, Hdec)),                              # bridge_w
            resident((1, Hdec)),                                 # bridge_b
            resident((Hdec, V)),                                 # out_w (hidden part)
            resident((Henc, V)),                                 # out_w (context part)
            resident((1, V)),                                    # out_b
        ],
        out_specs=pl.BlockSpec((1, B, V), lambda i, c: (i, 0, 0)),
        scratch_shapes=[pltpu.VMEM((B, Hdec), jnp.float32),      # carried hidden state
                        pltpu.VMEM((B, Etok), jnp.float32)],     # carried greedy embedding
    )
    return pl.pallas_call(
        _decoder_step_kernel,
        out_shape=jax.ShapeDtypeStruct((n_steps, B, V), jnp.float32),
        grid_spec=grid_spec,
        compiler_params=pltpu.CompilerParams(dimension_semantics=("arbitrary",)),
    )(coin, temb, enc_bsh, p["trg_embed"],
      p["dec_wih_e"], p["dec_wih_c"], p["dec_whh"], b_rz, b_n,
      p["bridge_w"], p["bridge_b"], p["out_w_h"], p["out_w_c"], p["out_b"])


# ----------------------------- model glue -----------------------------

def init_params(key, src_vocab, trg_vocab, n_kings, tok_emb, king_emb, enc_hidden, dec_hidden):
    ks = jax.random.split(key, 12)
    s = 0.1
    f32 = jnp.float32
    enc_in = tok_emb + king_emb
    p = {
        "src_embed": (jax.random.normal(ks[0], (src_vocab, tok_emb)) * s).astype(f32),
        "king_embed": (jax.random.normal(ks[1], (n_kings, king_emb)) * s).astype(f32),
        # gate-split weights: (3, In, H) so each gate matmul is lane-aligned, no (.,3H) slicing
        "enc_wih": (jax.random.normal(ks[2], (3, enc_in, enc_hidden)) * s).astype(f32),
        "enc_whh": (jax.random.normal(ks[3], (3, enc_hidden, enc_hidden)) * s).astype(f32),
        "enc_bih": jnp.zeros((3, 1, enc_hidden), f32),
        "enc_bhh": jnp.zeros((3, 1, enc_hidden), f32),
        "bridge_w": (jax.random.normal(ks[4], (enc_hidden, dec_hidden)) * s).astype(f32),
        "bridge_b": jnp.zeros((1, dec_hidden), f32),
        "trg_embed": (jax.random.normal(ks[5], (trg_vocab, tok_emb)) * s).astype(f32),
        "dec_wih_e": (jax.random.normal(ks[6], (3, tok_emb, dec_hidden)) * s).astype(f32),
        "dec_wih_c": (jax.random.normal(ks[7], (3, enc_hidden, dec_hidden)) * s).astype(f32),
        "dec_whh": (jax.random.normal(ks[8], (3, dec_hidden, dec_hidden)) * s).astype(f32),
        "dec_bih": jnp.zeros((3, 1, dec_hidden), f32),
        "dec_bhh": jnp.zeros((3, 1, dec_hidden), f32),
        "out_w_h": (jax.random.normal(ks[9], (dec_hidden, trg_vocab)) * s).astype(f32),
        "out_w_c": (jax.random.normal(ks[10], (enc_hidden, trg_vocab)) * s).astype(f32),
        "out_b": jnp.zeros((1, trg_vocab), f32),
    }
    return p


def encoder_forward(p, src, king_id):
    # src: (S, B) int32, king_id: (B,) int32 -> enc_out (S, B, Henc)
    S, B = src.shape
    tok = p["src_embed"][src]                                    # (S, B, Etok)
    king = p["king_embed"][king_id]                              # (B, Eking)
    king = jnp.broadcast_to(king[None], (S, B, king.shape[-1]))
    x = jnp.concatenate([tok, king], axis=-1)                    # (S, B, Ein)
    Ein = x.shape[-1]
    H = p["enc_whh"].shape[-1]

    # Hoisted input-side gemm for ALL timesteps (one big MXU gemm per gate, bias folded in).
    gi = gates_input_gemm(x.reshape(S * B, Ein), p["enc_wih"], p["enc_bih"])  # (3, S*B, H)
    gi = gi.reshape(3, S, B, H)

    # Fused sequential recurrence over S (weights resident, hidden carried in VMEM scratch).
    return enc_recurrence(gi, p["enc_whh"], p["enc_bhh"])        # (S, B, H)


def seq2seq_forward(p, src, trg, king_id, tf_key, teacher_forcing_ratio=0.5):
    # mirrors Seq2Seq.forward (outputs[0] = zeros; greedy argmax feedback unless teacher forcing)
    S, B = src.shape
    T = trg.shape[0]
    V = p["out_b"].shape[-1]

    # pad batch to a multiple of 8 sublanes (rows are independent; padded rows sliced off at end)
    B_pad = max(8, ((B + 7) // 8) * 8)
    pad = B_pad - B
    if pad:
        src = jnp.pad(src, ((0, 0), (0, pad)))
        trg = jnp.pad(trg, ((0, 0), (0, pad)))
        king_id = jnp.pad(king_id, ((0, pad),))

    enc_out = encoder_forward(p, src, king_id)                   # (S, B_pad, Henc)
    enc_bsh = jnp.transpose(enc_out, (1, 0, 2))                  # (B_pad, S, Henc) for MXU attn

    # teacher-forcing coins (device RNG): coin[i] drives the input token of decode step i
    # (step 0 always consumes trg[0], matching the reference module).
    n_steps = T - 1
    rand = jax.random.uniform(tf_key, (n_steps,)) < teacher_forcing_ratio
    coin = jnp.concatenate(
        [jnp.ones((1,), jnp.int32), rand[: n_steps - 1].astype(jnp.int32)])

    dec_outs = decoder_run(p, trg, enc_bsh, coin)                # (T-1, B_pad, V) log-softmax
    outputs = jnp.concatenate(
        [jnp.zeros((1, B_pad, V), jnp.float32), dec_outs], axis=0)
    return outputs[:, :B, :]                                     # (T, B, V)


if __name__ == "__main__":
    key = jax.random.PRNGKey(0)

    SRC_LEN, TRG_LEN, BATCH = 8, 8, 2
    TOK_EMB, KING_EMB = 16, 16
    ENC_HID, DEC_HID = 32, 32
    SRC_VOCAB, TRG_VOCAB, N_KINGS = 128, 128, 4

    kp, ks_, kt, kk, ktf = jax.random.split(key, 5)
    params = init_params(kp, SRC_VOCAB, TRG_VOCAB, N_KINGS, TOK_EMB, KING_EMB, ENC_HID, DEC_HID)
    src = jax.random.randint(ks_, (SRC_LEN, BATCH), 0, SRC_VOCAB, dtype=jnp.int32)
    trg = jax.random.randint(kt, (TRG_LEN, BATCH), 0, TRG_VOCAB, dtype=jnp.int32)
    king_id = jax.random.randint(kk, (BATCH,), 0, N_KINGS, dtype=jnp.int32)

    fwd = jax.jit(seq2seq_forward)
    outputs = fwd(params, src, trg, king_id, ktf, 0.5)
    jax.block_until_ready(outputs)
    assert outputs.shape == (TRG_LEN, BATCH, TRG_VOCAB)
    print("KERNEL_OK")
</pallas_src>

<mosaic_0001>
module attributes {stable_mosaic.version = 11 : i64} {
  func.func @_gates_input_gemm_kernel(%arg0: memref<64x32xf32, #tpu.memory_space<vmem>>, %arg1: memref<3x32x32xf32, #tpu.memory_space<vmem>>, %arg2: memref<3x1x32xf32, #tpu.memory_space<vmem>>, %arg3: memref<3x64x32xf32, #tpu.memory_space<vmem>>) attributes {dimension_semantics = [], scalar_prefetch = 0 : i64, scratch_operands = 0 : i64, tpu.core_type = #tpu.core_type<tc>} {
    %c0 = arith.constant 0 : index
    %c0_0 = arith.constant 0 : index
    %0 = vector.load %arg0[%c0, %c0_0] : memref<64x32xf32, #tpu.memory_space<vmem>>, vector<64x32xf32>
    %c0_1 = arith.constant 0 : index
    %c0_2 = arith.constant 0 : index
    %c0_3 = arith.constant 0 : index
    %1 = vector.load %arg1[%c0_1, %c0_2, %c0_3] : memref<3x32x32xf32, #tpu.memory_space<vmem>>, vector<3x32x32xf32>
    %c0_4 = arith.constant 0 : index
    %c0_5 = arith.constant 0 : index
    %c0_6 = arith.constant 0 : index
    %2 = vector.load %arg2[%c0_4, %c0_5, %c0_6] : memref<3x1x32xf32, #tpu.memory_space<vmem>>, vector<3x1x32xf32>
    %3 = vector.extract_strided_slice %1 {offsets = [0, 0, 0], sizes = [1, 32, 32], strides = [1, 1, 1]} : vector<3x32x32xf32> to vector<1x32x32xf32>
    %4 = vector.shape_cast %3 : vector<1x32x32xf32> to vector<32x32xf32>
    %cst = arith.constant dense<0.000000e+00> : vector<64x32xf32>
    %5 = tpu.matmul %0, %4, %cst {dimension_numbers = #tpu.dot_dimension_numbers<[1], [0], [0], [1], [0, 0, 1, 1], [], []>} : vector<64x32xf32>, vector<32x32xf32>, vector<64x32xf32> -> vector<64x32xf32>
    %6 = vector.extract_strided_slice %2 {offsets = [0, 0, 0], sizes = [1, 1, 32], strides = [1, 1, 1]} : vector<3x1x32xf32> to vector<1x1x32xf32>
    %7 = vector.shape_cast %6 : vector<1x1x32xf32> to vector<1x32xf32>
    %8 = vector.broadcast %7 : vector<1x32xf32> to vector<64x32xf32>
    %9 = arith.addf %5, %8 : vector<64x32xf32>
    %c0_7 = arith.constant 0 : index
    %c0_8 = arith.constant 0 : index
    %c0_9 = arith.constant 0 : index
    %10 = vector.load %arg3[%c0_7, %c0_8, %c0_9] : memref<3x64x32xf32, #tpu.memory_space<vmem>>, vector<1x64x32xf32>
    %11 = vector.shape_cast %10 : vector<1x64x32xf32> to vector<64x32xf32>
    %12 = vector.shape_cast %9 : vector<64x32xf32> to vector<1x64x32xf32>
    tpu.vector_store %arg3[%c0_7, %c0_8, %c0_9], %12 {strides = array<i32>} : memref<3x64x32xf32, #tpu.memory_space<vmem>>, vector<1x64x32xf32>,
    %13 = vector.extract_strided_slice %1 {offsets = [1, 0, 0], sizes = [1, 32, 32], strides = [1, 1, 1]} : vector<3x32x32xf32> to vector<1x32x32xf32>
    %14 = vector.shape_cast %13 : vector<1x32x32xf32> to vector<32x32xf32>
    %cst_10 = arith.constant dense<0.000000e+00> : vector<64x32xf32>
    %15 = tpu.matmul %0, %14, %cst_10 {dimension_numbers = #tpu.dot_dimension_numbers<[1], [0], [0], [1], [0, 0, 1, 1], [], []>} : vector<64x32xf32>, vector<32x32xf32>, vector<64x32xf32> -> vector<64x32xf32>
    %16 = vector.extract_strided_slice %2 {offsets = [1, 0, 0], sizes = [1, 1, 32], strides = [1, 1, 1]} : vector<3x1x32xf32> to vector<1x1x32xf32>
    %17 = vector.shape_cast %16 : vector<1x1x32xf32> to vector<1x32xf32>
    %18 = vector.broadcast %17 : vector<1x32xf32> to vector<64x32xf32>
    %19 = arith.addf %15, %18 : vector<64x32xf32>
    %c1 = arith.constant 1 : index
    %c0_11 = arith.constant 0 : index
    %c0_12 = arith.constant 0 : index
    %20 = vector.load %arg3[%c1, %c0_11, %c0_12] : memref<3x64x32xf32, #tpu.memory_space<vmem>>, vector<1x64x32xf32>
    %21 = vector.shape_cast %20 : vector<1x64x32xf32> to vector<64x32xf32>
    %22 = vector.shape_cast %19 : vector<64x32xf32> to vector<1x64x32xf32>
    tpu.vector_store %arg3[%c1, %c0_11, %c0_12], %22 {strides = array<i32>} : memref<3x64x32xf32, #tpu.memory_space<vmem>>, vector<1x64x32xf32>,
    %23 = vector.extract_strided_slice %1 {offsets = [2, 0, 0], sizes = [1, 32, 32], strides = [1, 1, 1]} : vector<3x32x32xf32> to vector<1x32x32xf32>
    %24 = vector.shape_cast %23 : vector<1x32x32xf32> to vector<32x32xf32>
    %cst_13 = arith.constant dense<0.000000e+00> : vector<64x32xf32>
    %25 = tpu.matmul %0, %24, %cst_13 {dimension_numbers = #tpu.dot_dimension_numbers<[1], [0], [0], [1], [0, 0, 1, 1], [], []>} : vector<64x32xf32>, vector<32x32xf32>, vector<64x32xf32> -> vector<64x32xf32>
    %26 = vector.extract_strided_slice %2 {offsets = [2, 0, 0], sizes = [1, 1, 32], strides = [1, 1, 1]} : vector<3x1x32xf32> to vector<1x1x32xf32>
    %27 = vector.shape_cast %26 : vector<1x1x32xf32> to vector<1x32xf32>
    %28 = vector.broadcast %27 : vector<1x32xf32> to vector<64x32xf32>
    %29 = arith.addf %25, %28 : vector<64x32xf32>
    %c2 = arith.constant 2 : index
    %c0_14 = arith.constant 0 : index
    %c0_15 = arith.constant 0 : index
    %30 = vector.load %arg3[%c2, %c0_14, %c0_15] : memref<3x64x32xf32, #tpu.memory_space<vmem>>, vector<1x64x32xf32>
    %31 = vector.shape_cast %30 : vector<1x64x32xf32> to vector<64x32xf32>
    %32 = vector.shape_cast %29 : vector<64x32xf32> to vector<1x64x32xf32>
    tpu.vector_store %arg3[%c2, %c0_14, %c0_15], %32 {strides = array<i32>} : memref<3x64x32xf32, #tpu.memory_space<vmem>>, vector<1x64x32xf32>,
    return
  }
}

module attributes {stable_mosaic.version = 11 : i64} {
  func.func @_enc_recurrence_kernel(%arg0: i32, %arg1: memref<3x1x8x32xf32, #tpu.memory_space<vmem>>, %arg2: memref<3x32x32xf32, #tpu.memory_space<vmem>>, %arg3: memref<3x1x32xf32, #tpu.memory_space<vmem>>, %arg4: memref<1x8x32xf32, #tpu.memory_space<vmem>>, %arg5: memref<8x32xf32, #tpu.memory_space<vmem>>) attributes {dimension_semantics = [#tpu.dimension_semantics<arbitrary>], iteration_bounds = array<i64: 8>, scalar_prefetch = 0 : i64, scratch_operands = 1 : i64, tpu.core_type = #tpu.core_type<tc>, window_params = [{transform_indices = @transform_0, window_bounds = array<i64: 3, 1, 8, 32>}, {pipeline_mode = #tpu.pipeline_mode<synchronous>, transform_indices = @transform_1, window_bounds = array<i64: 3, 32, 32>}, {pipeline_mode = #tpu.pipeline_mode<synchronous>, transform_indices = @transform_2, window_bounds = array<i64: 3, 1, 32>}, {transform_indices = @transform_3, window_bounds = array<i64: 1, 8, 32>}]} {
    %c0_i32 = arith.constant 0 : i32
    %0 = arith.cmpi eq, %arg0, %c0_i32 : i32
    %1 = arith.extui %0 : i1 to i32
    %c0_i32_0 = arith.constant 0 : i32
    %2 = arith.cmpi ne, %1, %c0_i32_0 : i32
    scf.if %2 {
      %cst_22 = arith.constant 0.000000e+00 : f32
      %58 = vector.broadcast %cst_22 : f32 to vector<8x32xf32>
      %c0_23 = arith.constant 0 : index
      %c0_24 = arith.constant 0 : index
      %59 = vector.load %arg5[%c0_23, %c0_24] : memref<8x32xf32, #tpu.memory_space<vmem>>, vector<8x32xf32>
      tpu.vector_store %arg5[%c0_23, %c0_24], %58 {strides = array<i32>} : memref<8x32xf32, #tpu.memory_space<vmem>>, vector<8x32xf32>,
    } else {
    }
    %c0 = arith.constant 0 : index
    %c0_1 = arith.constant 0 : index
    %3 = vector.load %arg5[%c0, %c0_1] : memref<8x32xf32, #tpu.memory_space<vmem>>, vector<8x32xf32>
    %c0_2 = arith.constant 0 : index
    %c0_3 = arith.constant 0 : index
    %c0_4 = arith.constant 0 : index
    %c0_5 = arith.constant 0 : index
    %4 = vector.load %arg1[%c0_2, %c0_3, %c0_4, %c0_5] : memref<3x1x8x32xf32, #tpu.memory_space<vmem>>, vector<3x1x8x32xf32>
    %c0_6 = arith.constant 0 : index
    %c0_7 = arith.constant 0 : index
    %c0_8 = arith.constant 0 : index
    %5 = vector.load %arg2[%c0_6, %c0_7, %c0_8] : memref<3x32x32xf32, #tpu.memory_space<vmem>>, vector<3x32x32xf32>
    %c0_9 = arith.constant 0 : index
    %c0_10 = arith.constant 0 : index
    %c0_11 = arith.constant 0 : index
    %6 = vector.load %arg3[%c0_9, %c0_10, %c0_11] : memref<3x1x32xf32, #tpu.memory_space<vmem>>, vector<3x1x32xf32>
    %7 = vector.extract_strided_slice %5 {offsets = [0, 0, 0], sizes = [1, 32, 32], strides = [1, 1, 1]} : vector<3x32x32xf32> to vector<1x32x32xf32>
    %8 = vector.shape_cast %7 : vector<1x32x32xf32> to vector<32x32xf32>
    %cst = arith.constant dense<0.000000e+00> : vector<8x32xf32>
    %9 = tpu.matmul %3, %8, %cst {dimension_numbers = #tpu.dot_dimension_numbers<[1], [0], [0], [1], [0, 0, 1, 1], [], []>} : vector<8x32xf32>, vector<32x32xf32>, vector<8x32xf32> -> vector<8x32xf32>
    %10 = vector.extract_strided_slice %6 {offsets = [0, 0, 0], sizes = [1, 1, 32], strides = [1, 1, 1]} : vector<3x1x32xf32> to vector<1x1x32xf32>
    %11 = vector.shape_cast %10 : vector<1x1x32xf32> to vector<1x32xf32>
    %12 = vector.broadcast %11 : vector<1x32xf32> to vector<8x32xf32>
    %13 = arith.addf %9, %12 : vector<8x32xf32>
    %14 = vector.extract_strided_slice %5 {offsets = [1, 0, 0], sizes = [1, 32, 32], strides = [1, 1, 1]} : vector<3x32x32xf32> to vector<1x32x32xf32>
    %15 = vector.shape_cast %14 : vector<1x32x32xf32> to vector<32x32xf32>
    %cst_12 = arith.constant dense<0.000000e+00> : vector<8x32xf32>
    %16 = tpu.matmul %3, %15, %cst_12 {dimension_numbers = #tpu.dot_dimension_numbers<[1], [0], [0], [1], [0, 0, 1, 1], [], []>} : vector<8x32xf32>, vector<32x32xf32>, vector<8x32xf32> -> vector<8x32xf32>
    %17 = vector.extract_strided_slice %6 {offsets = [1, 0, 0], sizes = [1, 1, 32], strides = [1, 1, 1]} : vector<3x1x32xf32> to vector<1x1x32xf32>
    %18 = vector.shape_cast %17 : vector<1x1x32xf32> to vector<1x32xf32>
    %19 = vector.broadcast %18 : vector<1x32xf32> to vector<8x32xf32>
    %20 = arith.addf %16, %19 : vector<8x32xf32>
    %21 = vector.extract_strided_slice %5 {offsets = [2, 0, 0], sizes = [1, 32, 32], strides = [1, 1, 1]} : vector<3x32x32xf32> to vector<1x32x32xf32>
    %22 = vector.shape_cast %21 : vector<1x32x32xf32> to vector<32x32xf32>
    %cst_13 = arith.constant dense<0.000000e+00> : vector<8x32xf32>
    %23 = tpu.matmul %3, %22, %cst_13 {dimension_numbers = #tpu.dot_dimension_numbers<[1], [0], [0], [1], [0, 0, 1, 1], [], []>} : vector<8x32xf32>, vector<32x32xf32>, vector<8x32xf32> -> vector<8x32xf32>
    %24 = vector.extract_strided_slice %6 {offsets = [2, 0, 0], sizes = [1, 1, 32], strides = [1, 1, 1]} : vector<3x1x32xf32> to vector<1x1x32xf32>
    %25 = vector.shape_cast %24 : vector<1x1x32xf32> to vector<1x32xf32>
    %26 = vector.broadcast %25 : vector<1x32xf32> to vector<8x32xf32>
    %27 = arith.addf %23, %26 : vector<8x32xf32>
    %28 = vector.extract_strided_slice %4 {offsets = [0, 0, 0, 0], sizes = [1, 1, 8, 32], strides = [1, 1, 1, 1]} : vector<3x1x8x32xf32> to vector<1x1x8x32xf32>
    %29 = vector.shape_cast %28 : vector<1x1x8x32xf32> to vector<8x32xf32>
    %30 = arith.addf %29, %13 : vector<8x32xf32>
    %31 = arith.negf %30 : vector<8x32xf32>
    %32 = math.exp %31 : vector<8x32xf32>
    %cst_14 = arith.constant 1.000000e+00 : f32
    %33 = vector.broadcast %cst_14 : f32 to vector<8x32xf32>
    %34 = arith.addf %33, %32 : vector<8x32xf32>
    %35 = arith.divf %33, %34 : vector<8x32xf32>
    %36 = vector.extract_strided_slice %4 {offsets = [1, 0, 0, 0], sizes = [1, 1, 8, 32], strides = [1, 1, 1, 1]} : vector<3x1x8x32xf32> to vector<1x1x8x32xf32>
    %37 = vector.shape_cast %36 : vector<1x1x8x32xf32> to vector<8x32xf32>
    %38 = arith.addf %37, %20 : vector<8x32xf32>
    %39 = arith.negf %38 : vector<8x32xf32>
    %40 = math.exp %39 : vector<8x32xf32>
    %cst_15 = arith.constant 1.000000e+00 : f32
    %41 = vector.broadcast %cst_15 : f32 to vector<8x32xf32>
    %42 = arith.addf %41, %40 : vector<8x32xf32>
    %43 = arith.divf %41, %42 : vector<8x32xf32>
    %44 = vector.extract_strided_slice %4 {offsets = [2, 0, 0, 0], sizes = [1, 1, 8, 32], strides = [1, 1, 1, 1]} : vector<3x1x8x32xf32> to vector<1x1x8x32xf32>
    %45 = vector.shape_cast %44 : vector<1x1x8x32xf32> to vector<8x32xf32>
    %46 = arith.mulf %35, %27 : vector<8x32xf32>
    %47 = arith.addf %45, %46 : vector<8x32xf32>
    %48 = math.tanh %47 : vector<8x32xf32>
    %cst_16 = arith.constant 1.000000e+00 : f32
    %49 = vector.broadcast %cst_16 : f32 to vector<8x32xf32>
    %50 = arith.subf %49, %43 : vector<8x32xf32>
    %51 = arith.mulf %50, %48 : vector<8x32xf32>
    %52 = arith.mulf %43, %3 : vector<8x32xf32>
    %53 = arith.addf %51, %52 : vector<8x32xf32>
    %c0_17 = arith.constant 0 : index
    %c0_18 = arith.constant 0 : index
    %54 = vector.load %arg5[%c0_17, %c0_18] : memref<8x32xf32, #tpu.memory_space<vmem>>, vector<8x32xf32>
    tpu.vector_store %arg5[%c0_17, %c0_18], %53 {strides = array<i32>} : memref<8x32xf32, #tpu.memory_space<vmem>>, vector<8x32xf32>,
    %c0_19 = arith.constant 0 : index
    %c0_20 = arith.constant 0 : index
    %c0_21 = arith.constant 0 : index
    %55 = vector.load %arg4[%c0_19, %c0_20, %c0_21] : memref<1x8x32xf32, #tpu.memory_space<vmem>>, vector<1x8x32xf32>
    %56 = vector.shape_cast %55 : vector<1x8x32xf32> to vector<8x32xf32>
    %57 = vector.shape_cast %53 : vector<8x32xf32> to vector<1x8x32xf32>
    tpu.vector_store %arg4[%c0_19, %c0_20, %c0_21], %57 {strides = array<i32>} : memref<1x8x32xf32, #tpu.memory_space<vmem>>, vector<1x8x32xf32>,
    return
  }
  func.func @transform_0(%arg0: i32) -> (i32, i32, i32, i32) {
    %c0_i32 = arith.constant 0 : i32
    %c0_i32_0 = arith.constant 0 : i32
    %c0_i32_1 = arith.constant 0 : i32
    %c0_i32_2 = arith.constant 0 : i32
    return %c0_i32, %arg0, %c0_i32_0, %c0_i32_1 : i32, i32, i32, i32
  }
  func.func @transform_1(%arg0: i32) -> (i32, i32, i32) {
    %c0_i32 = arith.constant 0 : i32
    %c0_i32_0 = arith.constant 0 : i32
    %c0_i32_1 = arith.constant 0 : i32
    %c0_i32_2 = arith.constant 0 : i32
    return %c0_i32, %c0_i32_0, %c0_i32_1 : i32, i32, i32
  }
  func.func @transform_2(%arg0: i32) -> (i32, i32, i32) {
    %c0_i32 = arith.constant 0 : i32
    %c0_i32_0 = arith.constant 0 : i32
    %c0_i32_1 = arith.constant 0 : i32
    %c0_i32_2 = arith.constant 0 : i32
    return %c0_i32, %c0_i32_0, %c0_i32_1 : i32, i32, i32
  }
  func.func @transform_3(%arg0: i32) -> (i32, i32, i32) {
    %c0_i32 = arith.constant 0 : i32
    %c0_i32_0 = arith.constant 0 : i32
    %c0_i32_1 = arith.constant 0 : i32
    return %arg0, %c0_i32, %c0_i32_0 : i32, i32, i32
  }
}

module attributes {stable_mosaic.version = 11 : i64} {
  func.func @_decoder_step_kernel(%arg0: i32, %arg1: memref<7xi32, #tpu.memory_space<smem>>, %arg2: memref<1x8x16xf32, #tpu.memory_space<vmem>>, %arg3: memref<8x8x32xf32, #tpu.memory_space<vmem>>, %arg4: memref<128x16xf32, #tpu.memory_space<vmem>>, %arg5: memref<3x16x32xf32, #tpu.memory_space<vmem>>, %arg6: memref<3x32x32xf32, #tpu.memory_space<vmem>>, %arg7: memref<3x32x32xf32, #tpu.memory_space<vmem>>, %arg8: memref<2x1x32xf32, #tpu.memory_space<vmem>>, %arg9: memref<2x1x32xf32, #tpu.memory_space<vmem>>, %arg10: memref<32x32xf32, #tpu.memory_space<vmem>>, %arg11: memref<1x32xf32, #tpu.memory_space<vmem>>, %arg12: memref<32x128xf32, #tpu.memory_space<vmem>>, %arg13: memref<32x128xf32, #tpu.memory_space<vmem>>, %arg14: memref<1x128xf32, #tpu.memory_space<vmem>>, %arg15: memref<1x8x128xf32, #tpu.memory_space<vmem>>, %arg16: memref<8x32xf32, #tpu.memory_space<vmem>>, %arg17: memref<8x16xf32, #tpu.memory_space<vmem>>) attributes {dimension_semantics = [#tpu.dimension_semantics<arbitrary>], iteration_bounds = array<i64: 7>, scalar_prefetch = 1 : i64, scratch_operands = 2 : i64, tpu.core_type = #tpu.core_type<tc>, window_params = [{transform_indices = @transform_0, window_bounds = array<i64: 1, 8, 16>}, {pipeline_mode = #tpu.pipeline_mode<synchronous>, transform_indices = @transform_1, window_bounds = array<i64: 8, 8, 32>}, {pipeline_mode = #tpu.pipeline_mode<synchronous>, transform_indices = @transform_2, window_bounds = array<i64: 128, 16>}, {pipeline_mode = #tpu.pipeline_mode<synchronous>, transform_indices = @transform_3, window_bounds = array<i64: 3, 16, 32>}, {pipeline_mode = #tpu.pipeline_mode<synchronous>, transform_indices = @transform_4, window_bounds = array<i64: 3, 32, 32>}, {pipeline_mode = #tpu.pipeline_mode<synchronous>, transform_indices = @transform_5, window_bounds = array<i64: 3, 32, 32>}, {pipeline_mode = #tpu.pipeline_mode<synchronous>, transform_indices = @transform_6, window_bounds = array<i64: 2, 1, 32>}, {pipeline_mode = #tpu.pipeline_mode<synchronous>, transform_indices = @transform_7, window_bounds = array<i64: 2, 1, 32>}, {pipeline_mode = #tpu.pipeline_mode<synchronous>, transform_indices = @transform_8, window_bounds = array<i64: 32, 32>}, {pipeline_mode = #tpu.pipeline_mode<synchronous>, transform_indices = @transform_9, window_bounds = array<i64: 1, 32>}, {pipeline_mode = #tpu.pipeline_mode<synchronous>, transform_indices = @transform_10, window_bounds = array<i64: 32, 128>}, {pipeline_mode = #tpu.pipeline_mode<synchronous>, transform_indices = @transform_11, window_bounds = array<i64: 32, 128>}, {pipeline_mode = #tpu.pipeline_mode<synchronous>, transform_indices = @transform_12, window_bounds = array<i64: 1, 128>}, {transform_indices = @transform_13, window_bounds = array<i64: 1, 8, 128>}]} {
    %c0 = arith.constant 0 : index
    %c0_0 = arith.constant 0 : index
    %c0_1 = arith.constant 0 : index
    %0 = vector.load %arg3[%c0, %c0_0, %c0_1] : memref<8x8x32xf32, #tpu.memory_space<vmem>>, vector<8x8x32xf32>
    %c0_i32 = arith.constant 0 : i32
    %1 = arith.cmpi eq, %arg0, %c0_i32 : i32
    %2 = arith.extui %1 : i1 to i32
    %c0_i32_2 = arith.constant 0 : i32
    %3 = arith.cmpi ne, %2, %c0_i32_2 : i32
    scf.if %3 {
      %140 = vector.extract_strided_slice %0 {offsets = [0, 7, 0], sizes = [8, 1, 32], strides = [1, 1, 1]} : vector<8x8x32xf32> to vector<8x1x32xf32>
      %141 = vector.shape_cast %140 : vector<8x1x32xf32> to vector<8x32xf32>
      %c0_62 = arith.constant 0 : index
      %c0_63 = arith.constant 0 : index
      %142 = vector.load %arg10[%c0_62, %c0_63] : memref<32x32xf32, #tpu.memory_space<vmem>>, vector<32x32xf32>
      %cst_64 = arith.constant dense<0.000000e+00> : vector<8x32xf32>
      %143 = tpu.matmul %141, %142, %cst_64 {dimension_numbers = #tpu.dot_dimension_numbers<[1], [0], [0], [1], [0, 0, 1, 1], [], []>} : vector<8x32xf32>, vector<32x32xf32>, vector<8x32xf32> -> vector<8x32xf32>
      %c0_65 = arith.constant 0 : index
      %c0_66 = arith.constant 0 : index
      %144 = vector.load %arg11[%c0_65, %c0_66] : memref<1x32xf32, #tpu.memory_space<vmem>>, vector<1x32xf32>
      %145 = vector.broadcast %144 : vector<1x32xf32> to vector<8x32xf32>
      %146 = arith.addf %143, %145 : vector<8x32xf32>
      %147 = math.tanh %146 : vector<8x32xf32>
      %c0_67 = arith.constant 0 : index
      %c0_68 = arith.constant 0 : index
      %148 = vector.load %arg16[%c0_67, %c0_68] : memref<8x32xf32, #tpu.memory_space<vmem>>, vector<8x32xf32>
      tpu.vector_store %arg16[%c0_67, %c0_68], %147 {strides = array<i32>} : memref<8x32xf32, #tpu.memory_space<vmem>>, vector<8x32xf32>,
      %cst_69 = arith.constant 0.000000e+00 : f32
      %149 = vector.broadcast %cst_69 : f32 to vector<8x16xf32>
      %c0_70 = arith.constant 0 : index
      %c0_71 = arith.constant 0 : index
      %150 = vector.load %arg17[%c0_70, %c0_71] : memref<8x16xf32, #tpu.memory_space<vmem>>, vector<8x16xf32>
      tpu.vector_store %arg17[%c0_70, %c0_71], %149 {strides = array<i32>} : memref<8x16xf32, #tpu.memory_space<vmem>>, vector<8x16xf32>,
    } else {
    }
    %c0_3 = arith.constant 0 : index
    %c0_4 = arith.constant 0 : index
    %4 = vector.load %arg16[%c0_3, %c0_4] : memref<8x32xf32, #tpu.memory_space<vmem>>, vector<8x32xf32>
    %5 = arith.index_cast %arg0 : i32 to index
    %6 = memref.load %arg1[%5] : memref<7xi32, #tpu.memory_space<smem>>
    %c1_i32 = arith.constant 1 : i32
    %7 = arith.cmpi eq, %6, %c1_i32 : i32
    %8 = arith.extui %7 : i1 to i32
    %9 = arith.sitofp %8 : i32 to f32
    %c0_5 = arith.constant 0 : index
    %c0_6 = arith.constant 0 : index
    %c0_7 = arith.constant 0 : index
    %10 = vector.load %arg2[%c0_5, %c0_6, %c0_7] : memref<1x8x16xf32, #tpu.memory_space<vmem>>, vector<1x8x16xf32>
    %11 = vector.shape_cast %10 : vector<1x8x16xf32> to vector<8x16xf32>
    %12 = vector.broadcast %9 : f32 to vector<8x16xf32>
    %13 = arith.mulf %12, %11 : vector<8x16xf32>
    %cst = arith.constant 1.000000e+00 : f32
    %14 = arith.subf %cst, %9 : f32
    %c0_8 = arith.constant 0 : index
    %c0_9 = arith.constant 0 : index
    %15 = vector.load %arg17[%c0_8, %c0_9] : memref<8x16xf32, #tpu.memory_space<vmem>>, vector<8x16xf32>
    %16 = vector.broadcast %14 : f32 to vector<8x16xf32>
    %17 = arith.mulf %16, %15 : vector<8x16xf32>
    %18 = arith.addf %13, %17 : vector<8x16xf32>
    %19 = vector.shape_cast %4 : vector<8x32xf32> to vector<8x1x32xf32>
    "tpu.trace_start"() <{level = 10 : i32, message = "bqh,bsh->bqs"}> : () -> ()
    %cst_10 = arith.constant dense<0.000000e+00> : vector<8x1x8xf32>
    %20 = tpu.matmul %19, %0, %cst_10 {dimension_numbers = #tpu.dot_dimension_numbers<[2], [2], [1], [1], [0, 0, 0, 1, 1, 1], [0], [0]>} : vector<8x1x32xf32>, vector<8x8x32xf32>, vector<8x1x8xf32> -> vector<8x1x8xf32>
    "tpu.trace_stop"() : () -> ()
    %cst_11 = arith.constant dense<0xFF800000> : vector<8x1xf32>
    %21 = vector.multi_reduction <maximumf>, %20, %cst_11 [2] : vector<8x1x8xf32> to vector<8x1xf32>
    %22 = vector.shape_cast %21 : vector<8x1xf32> to vector<8x1x1xf32>
    %23 = vector.broadcast %22 : vector<8x1x1xf32> to vector<8x1x8xf32>
    %24 = arith.subf %20, %23 : vector<8x1x8xf32>
    %25 = math.exp %24 : vector<8x1x8xf32>
    %cst_12 = arith.constant dense<0.000000e+00> : vector<8x1xf32>
    %26 = vector.multi_reduction <add>, %25, %cst_12 [2] : vector<8x1x8xf32> to vector<8x1xf32>
    %27 = vector.shape_cast %26 : vector<8x1xf32> to vector<8x1x1xf32>
    %28 = tpu.reciprocal %27 {approx = true} : vector<8x1x1xf32> -> vector<8x1x1xf32>
    %29 = vector.broadcast %28 : vector<8x1x1xf32> to vector<8x1x8xf32>
    %30 = arith.mulf %25, %29 : vector<8x1x8xf32>
    "tpu.trace_start"() <{level = 10 : i32, message = "bqs,bsh->bqh"}> : () -> ()
    %cst_13 = arith.constant dense<0.000000e+00> : vector<8x1x32xf32>
    %31 = tpu.matmul %30, %0, %cst_13 {dimension_numbers = #tpu.dot_dimension_numbers<[2], [1], [1], [2], [0, 0, 0, 1, 1, 2], [0], [0]>} : vector<8x1x8xf32>, vector<8x8x32xf32>, vector<8x1x32xf32> -> vector<8x1x32xf32>
    "tpu.trace_stop"() : () -> ()
    %32 = vector.shape_cast %31 : vector<8x1x32xf32> to vector<8x32xf32>
    %c0_14 = arith.constant 0 : index
    %c0_15 = arith.constant 0 : index
    %c0_16 = arith.constant 0 : index
    %33 = vector.load %arg5[%c0_14, %c0_15, %c0_16] : memref<3x16x32xf32, #tpu.memory_space<vmem>>, vector<3x16x32xf32>
    %c0_17 = arith.constant 0 : index
    %c0_18 = arith.constant 0 : index
    %c0_19 = arith.constant 0 : index
    %34 = vector.load %arg6[%c0_17, %c0_18, %c0_19] : memref<3x32x32xf32, #tpu.memory_space<vmem>>, vector<3x32x32xf32>
    %c0_20 = arith.constant 0 : index
    %c0_21 = arith.constant 0 : index
    %c0_22 = arith.constant 0 : index
    %35 = vector.load %arg7[%c0_20, %c0_21, %c0_22] : memref<3x32x32xf32, #tpu.memory_space<vmem>>, vector<3x32x32xf32>
    %c0_23 = arith.constant 0 : index
    %c0_24 = arith.constant 0 : index
    %c0_25 = arith.constant 0 : index
    %36 = vector.load %arg8[%c0_23, %c0_24, %c0_25] : memref<2x1x32xf32, #tpu.memory_space<vmem>>, vector<2x1x32xf32>
    %c0_26 = arith.constant 0 : index
    %c0_27 = arith.constant 0 : index
    %c0_28 = arith.constant 0 : index
    %37 = vector.load %arg9[%c0_26, %c0_27, %c0_28] : memref<2x1x32xf32, #tpu.memory_space<vmem>>, vector<2x1x32xf32>
    %38 = vector.extract_strided_slice %33 {offsets = [0, 0, 0], sizes = [1, 16, 32], strides = [1, 1, 1]} : vector<3x16x32xf32> to vector<1x16x32xf32>
    %39 = vector.shape_cast %38 : vector<1x16x32xf32> to vector<16x32xf32>
    %cst_29 = arith.constant dense<0.000000e+00> : vector<8x32xf32>
    %40 = tpu.matmul %18, %39, %cst_29 {dimension_numbers = #tpu.dot_dimension_numbers<[1], [0], [0], [1], [0, 0, 1, 1], [], []>} : vector<8x16xf32>, vector<16x32xf32>, vector<8x32xf32> -> vector<8x32xf32>
    %41 = vector.extract_strided_slice %34 {offsets = [0, 0, 0], sizes = [1, 32, 32], strides = [1, 1, 1]} : vector<3x32x32xf32> to vector<1x32x32xf32>
    %42 = vector.shape_cast %41 : vector<1x32x32xf32> to vector<32x32xf32>
    %cst_30 = arith.constant dense<0.000000e+00> : vector<8x32xf32>
    %43 = tpu.matmul %32, %42, %cst_30 {dimension_numbers = #tpu.dot_dimension_numbers<[1], [0], [0], [1], [0, 0, 1, 1], [], []>} : vector<8x32xf32>, vector<32x32xf32>, vector<8x32xf32> -> vector<8x32xf32>
    %44 = arith.addf %40, %43 : vector<8x32xf32>
    %45 = vector.extract_strided_slice %35 {offsets = [0, 0, 0], sizes = [1, 32, 32], strides = [1, 1, 1]} : vector<3x32x32xf32> to vector<1x32x32xf32>
    %46 = vector.shape_cast %45 : vector<1x32x32xf32> to vector<32x32xf32>
    %cst_31 = arith.constant dense<0.000000e+00> : vector<8x32xf32>
    %47 = tpu.matmul %4, %46, %cst_31 {dimension_numbers = #tpu.dot_dimension_numbers<[1], [0], [0], [1], [0, 0, 1, 1], [], []>} : vector<8x32xf32>, vector<32x32xf32>, vector<8x32xf32> -> vector<8x32xf32>
    %48 = arith.addf %44, %47 : vector<8x32xf32>
    %49 = vector.extract_strided_slice %36 {offsets = [0, 0, 0], sizes = [1, 1, 32], strides = [1, 1, 1]} : vector<2x1x32xf32> to vector<1x1x32xf32>
    %50 = vector.shape_cast %49 : vector<1x1x32xf32> to vector<1x32xf32>
    %51 = vector.broadcast %50 : vector<1x32xf32> to vector<8x32xf32>
    %52 = arith.addf %48, %51 : vector<8x32xf32>
    %53 = arith.negf %52 : vector<8x32xf32>
    %54 = math.exp %53 : vector<8x32xf32>
    %cst_32 = arith.constant 1.000000e+00 : f32
    %55 = vector.broadcast %cst_32 : f32 to vector<8x32xf32>
    %56 = arith.addf %55, %54 : vector<8x32xf32>
    %57 = arith.divf %55, %56 : vector<8x32xf32>
    %58 = vector.extract_strided_slice %33 {offsets = [1, 0, 0], sizes = [1, 16, 32], strides = [1, 1, 1]} : vector<3x16x32xf32> to vector<1x16x32xf32>
    %59 = vector.shape_cast %58 : vector<1x16x32xf32> to vector<16x32xf32>
    %cst_33 = arith.constant dense<0.000000e+00> : vector<8x32xf32>
    %60 = tpu.matmul %18, %59, %cst_33 {dimension_numbers = #tpu.dot_dimension_numbers<[1], [0], [0], [1], [0, 0, 1, 1], [], []>} : vector<8x16xf32>, vector<16x32xf32>, vector<8x32xf32> -> vector<8x32xf32>
    %61 = vector.extract_strided_slice %34 {offsets = [1, 0, 0], sizes = [1, 32, 32], strides = [1, 1, 1]} : vector<3x32x32xf32> to vector<1x32x32xf32>
    %62 = vector.shape_cast %61 : vector<1x32x32xf32> to vector<32x32xf32>
    %cst_34 = arith.constant dense<0.000000e+00> : vector<8x32xf32>
    %63 = tpu.matmul %32, %62, %cst_34 {dimension_numbers = #tpu.dot_dimension_numbers<[1], [0], [0], [1], [0, 0, 1, 1], [], []>} : vector<8x32xf32>, vector<32x32xf32>, vector<8x32xf32> -> vector<8x32xf32>
    %64 = arith.addf %60, %63 : vector<8x32xf32>
    %65 = vector.extract_strided_slice %35 {offsets = [1, 0, 0], sizes = [1, 32, 32], strides = [1, 1, 1]} : vector<3x32x32xf32> to vector<1x32x32xf32>
    %66 = vector.shape_cast %65 : vector<1x32x32xf32> to vector<32x32xf32>
    %cst_35 = arith.constant dense<0.000000e+00> : vector<8x32xf32>
    %67 = tpu.matmul %4, %66, %cst_35 {dimension_numbers = #tpu.dot_dimension_numbers<[1], [0], [0], [1], [0, 0, 1, 1], [], []>} : vector<8x32xf32>, vector<32x32xf32>, vector<8x32xf32> -> vector<8x32xf32>
    %68 = arith.addf %64, %67 : vector<8x32xf32>
    %69 = vector.extract_strided_slice %36 {offsets = [1, 0, 0], sizes = [1, 1, 32], strides = [1, 1, 1]} : vector<2x1x32xf32> to vector<1x1x32xf32>
    %70 = vector.shape_cast %69 : vector<1x1x32xf32> to vector<1x32xf32>
    %71 = vector.broadcast %70 : vector<1x32xf32> to vector<8x32xf32>
    %72 = arith.addf %68, %71 : vector<8x32xf32>
    %73 = arith.negf %72 : vector<8x32xf32>
    %74 = math.exp %73 : vector<8x32xf32>
    %cst_36 = arith.constant 1.000000e+00 : f32
    %75 = vector.broadcast %cst_36 : f32 to vector<8x32xf32>
    %76 = arith.addf %75, %74 : vector<8x32xf32>
    %77 = arith.divf %75, %76 : vector<8x32xf32>
    %78 = vector.extract_strided_slice %33 {offsets = [2, 0, 0], sizes = [1, 16, 32], strides = [1, 1, 1]} : vector<3x16x32xf32> to vector<1x16x32xf32>
    %79 = vector.shape_cast %78 : vector<1x16x32xf32> to vector<16x32xf32>
    %cst_37 = arith.constant dense<0.000000e+00> : vector<8x32xf32>
    %80 = tpu.matmul %18, %79, %cst_37 {dimension_numbers = #tpu.dot_dimension_numbers<[1], [0], [0], [1], [0, 0, 1, 1], [], []>} : vector<8x16xf32>, vector<16x32xf32>, vector<8x32xf32> -> vector<8x32xf32>
    %81 = vector.extract_strided_slice %34 {offsets = [2, 0, 0], sizes = [1, 32, 32], strides = [1, 1, 1]} : vector<3x32x32xf32> to vector<1x32x32xf32>
    %82 = vector.shape_cast %81 : vector<1x32x32xf32> to vector<32x32xf32>
    %cst_38 = arith.constant dense<0.000000e+00> : vector<8x32xf32>
    %83 = tpu.matmul %32, %82, %cst_38 {dimension_numbers = #tpu.dot_dimension_numbers<[1], [0], [0], [1], [0, 0, 1, 1], [], []>} : vector<8x32xf32>, vector<32x32xf32>, vector<8x32xf32> -> vector<8x32xf32>
    %84 = arith.addf %80, %83 : vector<8x32xf32>
    %85 = vector.extract_strided_slice %37 {offsets = [0, 0, 0], sizes = [1, 1, 32], strides = [1, 1, 1]} : vector<2x1x32xf32> to vector<1x1x32xf32>
    %86 = vector.shape_cast %85 : vector<1x1x32xf32> to vector<1x32xf32>
    %87 = vector.broadcast %86 : vector<1x32xf32> to vector<8x32xf32>
    %88 = arith.addf %84, %87 : vector<8x32xf32>
    %89 = vector.extract_strided_slice %35 {offsets = [2, 0, 0], sizes = [1, 32, 32], strides = [1, 1, 1]} : vector<3x32x32xf32> to vector<1x32x32xf32>
    %90 = vector.shape_cast %89 : vector<1x32x32xf32> to vector<32x32xf32>
    %cst_39 = arith.constant dense<0.000000e+00> : vector<8x32xf32>
    %91 = tpu.matmul %4, %90, %cst_39 {dimension_numbers = #tpu.dot_dimension_numbers<[1], [0], [0], [1], [0, 0, 1, 1], [], []>} : vector<8x32xf32>, vector<32x32xf32>, vector<8x32xf32> -> vector<8x32xf32>
    %92 = vector.extract_strided_slice %37 {offsets = [1, 0, 0], sizes = [1, 1, 32], strides = [1, 1, 1]} : vector<2x1x32xf32> to vector<1x1x32xf32>
    %93 = vector.shape_cast %92 : vector<1x1x32xf32> to vector<1x32xf32>
    %94 = vector.broadcast %93 : vector<1x32xf32> to vector<8x32xf32>
    %95 = arith.addf %91, %94 : vector<8x32xf32>
    %96 = arith.mulf %57, %95 : vector<8x32xf32>
    %97 = arith.addf %88, %96 : vector<8x32xf32>
    %98 = math.tanh %97 : vector<8x32xf32>
    %cst_40 = arith.constant 1.000000e+00 : f32
    %99 = vector.broadcast %cst_40 : f32 to vector<8x32xf32>
    %100 = arith.subf %99, %77 : vector<8x32xf32>
    %101 = arith.mulf %100, %98 : vector<8x32xf32>
    %102 = arith.mulf %77, %4 : vector<8x32xf32>
    %103 = arith.addf %101, %102 : vector<8x32xf32>
    %c0_41 = arith.constant 0 : index
    %c0_42 = arith.constant 0 : index
    %104 = vector.load %arg16[%c0_41, %c0_42] : memref<8x32xf32, #tpu.memory_space<vmem>>, vector<8x32xf32>
    tpu.vector_store %arg16[%c0_41, %c0_42], %103 {strides = array<i32>} : memref<8x32xf32, #tpu.memory_space<vmem>>, vector<8x32xf32>,
    %c0_43 = arith.constant 0 : index
    %c0_44 = arith.constant 0 : index
    %105 = vector.load %arg12[%c0_43, %c0_44] : memref<32x128xf32, #tpu.memory_space<vmem>>, vector<32x128xf32>
    %cst_45 = arith.constant dense<0.000000e+00> : vector<8x128xf32>
    %106 = tpu.matmul %103, %105, %cst_45 {dimension_numbers = #tpu.dot_dimension_numbers<[1], [0], [0], [1], [0, 0, 1, 1], [], []>} : vector<8x32xf32>, vector<32x128xf32>, vector<8x128xf32> -> vector<8x128xf32>
    %c0_46 = arith.constant 0 : index
    %c0_47 = arith.constant 0 : index
    %107 = vector.load %arg13[%c0_46, %c0_47] : memref<32x128xf32, #tpu.memory_space<vmem>>, vector<32x128xf32>
    %cst_48 = arith.constant dense<0.000000e+00> : vector<8x128xf32>
    %108 = tpu.matmul %32, %107, %cst_48 {dimension_numbers = #tpu.dot_dimension_numbers<[1], [0], [0], [1], [0, 0, 1, 1], [], []>} : vector<8x32xf32>, vector<32x128xf32>, vector<8x128xf32> -> vector<8x128xf32>
    %109 = arith.addf %106, %108 : vector<8x128xf32>
    %c0_49 = arith.constant 0 : index
    %c0_50 = arith.constant 0 : index
    %110 = vector.load %arg14[%c0_49, %c0_50] : memref<1x128xf32, #tpu.memory_space<vmem>>, vector<1x128xf32>
    %111 = vector.broadcast %110 : vector<1x128xf32> to vector<8x128xf32>
    %112 = arith.addf %109, %111 : vector<8x128xf32>
    %cst_51 = arith.constant dense<0xFF800000> : vector<8xf32>
    %113 = vector.multi_reduction <maximumf>, %112, %cst_51 [1] : vector<8x128xf32> to vector<8xf32>
    %114 = vector.shape_cast %113 : vector<8xf32> to vector<8x1xf32>
    %115 = vector.broadcast %114 : vector<8x1xf32> to vector<8x128xf32>
    %116 = arith.subf %112, %115 : vector<8x128xf32>
    %117 = math.exp %116 : vector<8x128xf32>
    %cst_52 = arith.constant dense<0.000000e+00> : vector<8xf32>
    %118 = vector.multi_reduction <add>, %117, %cst_52 [1] : vector<8x128xf32> to vector<8xf32>
    %119 = vector.shape_cast %118 : vector<8xf32> to vector<8x1xf32>
    %120 = math.log %119 : vector<8x1xf32>
    %121 = vector.broadcast %120 : vector<8x1xf32> to vector<8x128xf32>
    %122 = arith.subf %116, %121 : vector<8x128xf32>
    %c0_53 = arith.constant 0 : index
    %c0_54 = arith.constant 0 : index
    %c0_55 = arith.constant 0 : index
    %123 = vector.load %arg15[%c0_53, %c0_54, %c0_55] : memref<1x8x128xf32, #tpu.memory_space<vmem>>, vector<1x8x128xf32>
    %124 = vector.shape_cast %123 : vector<1x8x128xf32> to vector<8x128xf32>
    %125 = vector.shape_cast %122 : vector<8x128xf32> to vector<1x8x128xf32>
    tpu.vector_store %arg15[%c0_53, %c0_54, %c0_55], %125 {strides = array<i32>} : memref<1x8x128xf32, #tpu.memory_space<vmem>>, vector<1x8x128xf32>,
    %126 = tpu.iota {dimensions = array<i32: 1>} : vector<8x128xi32>
    %127 = vector.broadcast %114 : vector<8x1xf32> to vector<8x128xf32>
    %128 = arith.cmpf oeq, %112, %127 : vector<8x128xf32>
    %c128_i32 = arith.constant 128 : i32
    %129 = vector.broadcast %c128_i32 : i32 to vector<8x128xi32>
    %130 = arith.select %128, %126, %129 : vector<8x128xi1>, vector<8x128xi32>
    %cst_56 = arith.constant dense<2147483647> : vector<8xi32>
    %131 = vector.multi_reduction <minsi>, %130, %cst_56 [1] : vector<8x128xi32> to vector<8xi32>
    %132 = vector.shape_cast %131 : vector<8xi32> to vector<8x1xi32>
    %133 = vector.broadcast %132 : vector<8x1xi32> to vector<8x128xi32>
    %134 = arith.cmpi eq, %126, %133 : vector<8x128xi32>
    %135 = arith.extui %134 : vector<8x128xi1> to vector<8x128xi32>
    %136 = arith.sitofp %135 : vector<8x128xi32> to vector<8x128xf32>
    %c0_57 = arith.constant 0 : index
    %c0_58 = arith.constant 0 : index
    %137 = vector.load %arg4[%c0_57, %c0_58] : memref<128x16xf32, #tpu.memory_space<vmem>>, vector<128x16xf32>
    %cst_59 = arith.constant dense<0.000000e+00> : vector<8x16xf32>
    %138 = tpu.matmul %136, %137, %cst_59 {dimension_numbers = #tpu.dot_dimension_numbers<[1], [0], [0], [1], [0, 0, 1, 1], [], []>} : vector<8x128xf32>, vector<128x16xf32>, vector<8x16xf32> -> vector<8x16xf32>
    %c0_60 = arith.constant 0 : index
    %c0_61 = arith.constant 0 : index
    %139 = vector.load %arg17[%c0_60, %c0_61] : memref<8x16xf32, #tpu.memory_space<vmem>>, vector<8x16xf32>
    tpu.vector_store %arg17[%c0_60, %c0_61], %138 {strides = array<i32>} : memref<8x16xf32, #tpu.memory_space<vmem>>, vector<8x16xf32>,
    return
  }
  func.func @transform_0(%arg0: i32, %arg1: memref<7xi32, #tpu.memory_space<smem>>) -> (i32, i32, i32) {
    %c0_i32 = arith.constant 0 : i32
    %c0_i32_0 = arith.constant 0 : i32
    %c0_i32_1 = arith.constant 0 : i32
    return %arg0, %c0_i32, %c0_i32_0 : i32, i32, i32
  }
  func.func @transform_1(%arg0: i32, %arg1: memref<7xi32, #tpu.memory_space<smem>>) -> (i32, i32, i32) {
    %c0_i32 = arith.constant 0 : i32
    %c0_i32_0 = arith.constant 0 : i32
    %c0_i32_1 = arith.constant 0 : i32
    %c0_i32_2 = arith.constant 0 : i32
    return %c0_i32, %c0_i32_0, %c0_i32_1 : i32, i32, i32
  }
  func.func @transform_2(%arg0: i32, %arg1: memref<7xi32, #tpu.memory_space<smem>>) -> (i32, i32) {
    %c0_i32 = arith.constant 0 : i32
    %c0_i32_0 = arith.constant 0 : i32
    %c0_i32_1 = arith.constant 0 : i32
    return %c0_i32, %c0_i32_0 : i32, i32
  }
  func.func @transform_3(%arg0: i32, %arg1: memref<7xi32, #tpu.memory_space<smem>>) -> (i32, i32, i32) {
    %c0_i32 = arith.constant 0 : i32
    %c0_i32_0 = arith.constant 0 : i32
    %c0_i32_1 = arith.constant 0 : i32
    %c0_i32_2 = arith.constant 0 : i32
    return %c0_i32, %c0_i32_0, %c0_i32_1 : i32, i32, i32
  }
  func.func @transform_4(%arg0: i32, %arg1: memref<7xi32, #tpu.memory_space<smem>>) -> (i32, i32, i32) {
    %c0_i32 = arith.constant 0 : i32
    %c0_i32_0 = arith.constant 0 : i32
    %c0_i32_1 = arith.constant 0 : i32
    %c0_i32_2 = arith.constant 0 : i32
    return %c0_i32, %c0_i32_0, %c0_i32_1 : i32, i32, i32
  }
  func.func @transform_5(%arg0: i32, %arg1: memref<7xi32, #tpu.memory_space<smem>>) -> (i32, i32, i32) {
    %c0_i32 = arith.constant 0 : i32
    %c0_i32_0 = arith.constant 0 : i32
    %c0_i32_1 = arith.constant 0 : i32
    %c0_i32_2 = arith.constant 0 : i32
    return %c0_i32, %c0_i32_0, %c0_i32_1 : i32, i32, i32
  }
  func.func @transform_6(%arg0: i32, %arg1: memref<7xi32, #tpu.memory_space<smem>>) -> (i32, i32, i32) {
    %c0_i32 = arith.constant 0 : i32
    %c0_i32_0 = arith.constant 0 : i32
    %c0_i32_1 = arith.constant 0 : i32
    %c0_i32_2 = arith.constant 0 : i32
    return %c0_i32, %c0_i32_0, %c0_i32_1 : i32, i32, i32
  }
  func.func @transform_7(%arg0: i32, %arg1: memref<7xi32, #tpu.memory_space<smem>>) -> (i32, i32, i32) {
    %c0_i32 = arith.constant 0 : i32
    %c0_i32_0 = arith.constant 0 : i32
    %c0_i32_1 = arith.constant 0 : i32
    %c0_i32_2 = arith.constant 0 : i32
    return %c0_i32, %c0_i32_0, %c0_i32_1 : i32, i32, i32
  }
  func.func @transform_8(%arg0: i32, %arg1: memref<7xi32, #tpu.memory_space<smem>>) -> (i32, i32) {
    %c0_i32 = arith.constant 0 : i32
    %c0_i32_0 = arith.constant 0 : i32
    %c0_i32_1 = arith.constant 0 : i32
    return %c0_i32, %c0_i32_0 : i32, i32
  }
  func.func @transform_9(%arg0: i32, %arg1: memref<7xi32, #tpu.memory_space<smem>>) -> (i32, i32) {
    %c0_i32 = arith.constant 0 : i32
    %c0_i32_0 = arith.constant 0 : i32
    %c0_i32_1 = arith.constant 0 : i32
    return %c0_i32, %c0_i32_0 : i32, i32
  }
  func.func @transform_10(%arg0: i32, %arg1: memref<7xi32, #tpu.memory_space<smem>>) -> (i32, i32) {
    %c0_i32 = arith.constant 0 : i32
    %c0_i32_0 = arith.constant 0 : i32
    %c0_i32_1 = arith.constant 0 : i32
    return %c0_i32, %c0_i32_0 : i32, i32
  }
  func.func @transform_11(%arg0: i32, %arg1: memref<7xi32, #tpu.memory_space<smem>>) -> (i32, i32) {
    %c0_i32 = arith.constant 0 : i32
    %c0_i32_0 = arith.constant 0 : i32
    %c0_i32_1 = arith.constant 0 : i32
    return %c0_i32, %c0_i32_0 : i32, i32
  }
  func.func @transform_12(%arg0: i32, %arg1: memref<7xi32, #tpu.memory_space<smem>>) -> (i32, i32) {
    %c0_i32 = arith.constant 0 : i32
    %c0_i32_0 = arith.constant 0 : i32
    %c0_i32_1 = arith.constant 0 : i32
    return %c0_i32, %c0_i32_0 : i32, i32
  }
  func.func @transform_13(%arg0: i32, %arg1: memref<7xi32, #tpu.memory_space<smem>>) -> (i32, i32, i32) {
    %c0_i32 = arith.constant 0 : i32
    %c0_i32_0 = arith.constant 0 : i32
    %c0_i32_1 = arith.constant 0 : i32
    return %arg0, %c0_i32, %c0_i32_0 : i32, i32, i32
  }
}

</mosaic_0001>

<bundles_post_ra>
// kernel: seq2seq_forward.3
= control target key start
LH: loop header
LB: loop body
LE: loop exit
PB: predicated region body
PF: predicated region fallthrough
CT: control target
= control target key end

     0   :  { %vm43_vm0 = vcmask 261120   ;;  %s801_s1 = inlined_call_operand.vmem [shape: f32[3,32,32], index: 1, kind: input, shape index: {}]   ;;  %s802_s0 = inlined_call_operand.vmem [shape: f32[64,32], index: 0, kind: input, shape index: {}]   ;;  %s803_s2 = inlined_call_operand.vmem [shape: f32[3,1,32], index: 2, kind: input, shape index: {}]   ;;  %s804_s3 = inlined_call_operand.vmem [shape: f32[3,64,32], index: 3, kind: output, shape index: {}]  }
   0x1   :  { %v22_v0 = vld [vmem:[%s801_s1] sm:$0xff]  ;;  %v23_v1 = vld [vmem:[%s801_s1 + $0x8] sm:$0xff]  ;;  %v24_v2 = vld [vmem:[%s801_s1 + $0x10] sm:$0xff] }
   0x2   :  { %v564_v3 = vpack.c.bf16 %v23_v1, %v22_v0  ;;  %v25_v4 = vld [vmem:[%s801_s1 + $0x18] sm:$0xff]  ;;  %v14_v5 = vld [vmem:[%s802_s0] sm:$0xff]  ;;  %v27_v9 = vld [vmem:[%s801_s1 + $0x28] sm:$0xff] }
   0x3   :  { %v18_v6 = vld [vmem:[%s802_s0 + $0x20] sm:$0xff]  ;;  %v568_v7 = vpack.c.bf16 %v25_v4, %v24_v2  ;;  %512 = vmatprep.mubr.msk.f32.mxu0 %vm43_vm0, %v14_v5  ;;  %v31_v11 = vld [vmem:[%s801_s1 + $0x48] sm:$0xff]  ;;  %v28_v14 = vld [vmem:[%s801_s1 + $0x30] sm:$0xff] }
   0x4   :  { %518 = vmatprep.mubr.msk.f32.mxu1 %vm43_vm0, %v18_v6  ;;  %v26_v8 = vld [vmem:[%s801_s1 + $0x20] sm:$0xff]  ;;  %565 = vmatprep.subr.bf16.mxu0 %v564_v3  ;;  %v29_v15 = vld [vmem:[%s801_s1 + $0x38] sm:$0xff]  ;;  %v32_v16 = vld [vmem:[%s801_s1 + $0x50] sm:$0xff] }
   0x5   :  { %588 = vmatprep.subr.bf16.mxu1 %v564_v3  ;;  %v30_v10 = vld [vmem:[%s801_s1 + $0x40] sm:$0xff]  ;;  %567 = vmatpush3.bf16.msra.mxu0 %v564_v3  ;;  %v572_v12 = vpack.c.bf16 %v27_v9, %v26_v8  ;;  %v33_v17 = vld [vmem:[%s801_s1 + $0x58] sm:$0xff]  ;;  %v15_v18 = vld [vmem:[%s802_s0 + $0x8] sm:$0xff]  ;;  %v576_v22 = vpack.c.bf16 %v29_v15, %v28_v14 }
   0x6   :  { %590 = vmatpush3.bf16.msra.mxu1 %v564_v3  ;;  %569 = vmatprep.subr.bf16.mxu0 %v568_v7  ;;  %v580_v13 = vpack.c.bf16 %v31_v11, %v30_v10  ;;  %v19_v19 = vld [vmem:[%s802_s0 + $0x28] sm:$0xff]  ;;  %v16_v20 = vld [vmem:[%s802_s0 + $0x10] sm:$0xff]  ;;  %v584_v23 = vpack.c.bf16 %v33_v17, %v32_v16  ;;  %v17_v24 = vld [vmem:[%s802_s0 + $0x18] sm:$0xff] }
   0x7   :  { %589 = vmatprep.subr.bf16.mxu1 %v568_v7  ;;  %v20_v21 = vld [vmem:[%s802_s0 + $0x30] sm:$0xff]  ;;  %v21_v25 = vld [vmem:[%s802_s0 + $0x38] sm:$0xff]  ;;  %v425_v26 = vld [vmem:[%s803_s2] ss:$0 sm:$0xff] }
   0x8   :  { %v434_v43 = vld [vmem:[%s803_s2 + $0x1] ss:$0 sm:$0xff]  ;;  %v451_v44 = vld [vmem:[%s803_s2 + $0x2] ss:$0 sm:$0xff] }
   0x9   :  { %571 = vmatpush3.bf16.msra.mxu0 %v568_v7 }
   0xa   :  { %591 = vmatpush3.bf16.msra.mxu1 %v568_v7  ;;  %581 = vmatprep.subr.bf16.mxu0 %v580_v13 }
   0xb   :  { %573 = vmatprep.subr.bf16.mxu1 %v572_v12 }
   0xc   :  { %513 = vmatmul.mubr.msk.f32.vlgmr.msra.gmra.mrb[0].mxu0 %vm43_vm0, %v15_v18 }
   0xd   :  { %519 = vmatmul.mubr.msk.f32.vlgmr.msra.gmra.mrb[0].mxu1 %vm43_vm0, %v19_v19  ;;  %583 = vmatpush3.bf16.msra.mxu0 %v580_v13 }
   0xe   :  { %575 = vmatpush3.bf16.msra.mxu1 %v572_v12  ;;  %515 = vmatprep.mubr.msk.f32.mxu0 %vm43_vm0, %v16_v20 }
   0xf   :  { %521 = vmatprep.mubr.msk.f32.mxu1 %vm43_vm0, %v20_v21  ;;  %577 = vmatprep.subr.bf16.mxu1 %v576_v22 }
  0x10   :  { %585 = vmatprep.subr.bf16.mxu0 %v584_v23  ;;  %516 = vmatmul.mubr.msk.f32.gmra.mrb[2].mxu0 %vm43_vm0, %v17_v24 }
  0x11   :  { %522 = vmatmul.mubr.msk.f32.gmra.mrb[2].mxu1 %vm43_vm0, %v21_v25  ;;  %587 = vmatpush3.bf16.msra.mxu0 %v584_v23 }
  0x12   :  { %579 = vmatpush3.bf16.msra.mxu1 %v576_v22  ;;  %532 = vmatprep.mubr.msk.f32.mxu1 %vm43_vm0, %v14_v5 }
  0x13   :  { %552 = vmatprep.mubr.msk.f32.mxu0 %vm43_vm0, %v14_v5 }
  0x14   :  { %553 = vmatmul.mubr.msk.f32.vlgmr.msra.gmra.mrb[4].mxu0 %vm43_vm0, %v15_v18 }
  0x15   :  { %533 = vmatmul.mubr.msk.f32.vlgmr.msra.gmra.mrb[4].mxu1 %vm43_vm0, %v15_v18  ;;  %555 = vmatprep.mubr.msk.f32.mxu0 %vm43_vm0, %v16_v20 }
  0x16   :  { %535 = vmatprep.mubr.msk.f32.mxu1 %vm43_vm0, %v16_v20 }
  0x18   :  { %556 = vmatmul.mubr.msk.f32.gmra.mrb[6].mxu0 %vm43_vm0, %v17_v24 }
  0x19   :  { %536 = vmatmul.mubr.msk.f32.gmra.mrb[6].mxu1 %vm43_vm0, %v17_v24  ;;  %558 = vmatprep.mubr.msk.f32.mxu0 %vm43_vm0, %v18_v6 }
  0x1a   :  { %538 = vmatprep.mubr.msk.f32.mxu1 %vm43_vm0, %v18_v6 }
  0x1c   :  { %559 = vmatmul.mubr.msk.f32.gmra.mrb[8].mxu0 %vm43_vm0, %v19_v19 }
  0x1d   :  { %539 = vmatmul.mubr.msk.f32.gmra.mrb[8].mxu1 %vm43_vm0, %v19_v19  ;;  %561 = vmatprep.mubr.msk.f32.mxu0 %vm43_vm0, %v20_v21 }
  0x1e   :  { %541 = vmatprep.mubr.msk.f32.mxu1 %vm43_vm0, %v20_v21 }
  0x20   :  { %562 = vmatmul.mubr.msk.f32.gmra.mrb[10].mxu0 %vm43_vm0, %v21_v25 }
  0x21   :  { %542 = vmatmul.mubr.msk.f32.gmra.mrb[10].mxu1 %vm43_vm0, %v21_v25 }
  0xdf   :  { %v514_v27 = vpop.f32.mrb[0].mxu0 }
  0xe0   :  { %v520_v28 = vpop.f32.mrb[0].mxu1  ;;  %v140_v29 = vadd.f32 %v514_v27, %v425_v26  ;;  %v134_v31 = vpop.f32.mrb[1].mxu0 }
  0xe1   :  { %v160_v30 = vadd.f32 %v520_v28, %v425_v26  ;;  %v154_v32 = vpop.f32.mrb[1].mxu1  ;;  %v135_v33 = vadd.f32 %v425_v26, %v134_v31 }
  0xe2   :  { %v155_v34 = vadd.f32 %v425_v26, %v154_v32  ;;  %174 = vst.msk [vmem:[%s804_s3 + $0x8] sm:$0xff] %vm43_vm0, %v140_v29 }
  0xe3   :  { %178 = vst.msk [vmem:[%s804_s3 + $0x28] sm:$0xff] %vm43_vm0, %v160_v30  ;;  %173 = vst.msk [vmem:[%s804_s3] sm:$0xff] %vm43_vm0, %v135_v33  ;;  %v517_v35 = vpop.f32.mrb[2].mxu0 }
  0xe4   :  { %177 = vst.msk [vmem:[%s804_s3 + $0x20] sm:$0xff] %vm43_vm0, %v155_v34  ;;  %v523_v36 = vpop.f32.mrb[2].mxu1  ;;  %v150_v37 = vadd.f32 %v517_v35, %v425_v26  ;;  %v144_v39 = vpop.f32.mrb[3].mxu0 }
  0xe5   :  { %v170_v38 = vadd.f32 %v523_v36, %v425_v26  ;;  %v164_v40 = vpop.f32.mrb[3].mxu1  ;;  %v145_v41 = vadd.f32 %v425_v26, %v144_v39 }
  0xe6   :  { %v165_v42 = vadd.f32 %v425_v26, %v164_v40  ;;  %176 = vst.msk [vmem:[%s804_s3 + $0x18] sm:$0xff] %vm43_vm0, %v150_v37 }
  0xe7   :  { %180 = vst.msk [vmem:[%s804_s3 + $0x38] sm:$0xff] %vm43_vm0, %v170_v38  ;;  %175 = vst.msk [vmem:[%s804_s3 + $0x10] sm:$0xff] %vm43_vm0, %v145_v41  ;;  %v554_v46 = vpop.f32.mrb[4].mxu0 }
  0xe8   :  { %179 = vst.msk [vmem:[%s804_s3 + $0x30] sm:$0xff] %vm43_vm0, %v165_v42  ;;  %v534_v45 = vpop.f32.mrb[4].mxu1  ;;  %v379_v48 = vadd.f32 %v554_v46, %v451_v44  ;;  %v373_v50 = vpop.f32.mrb[5].mxu0 }
  0xe9   :  { %v259_v47 = vadd.f32 %v534_v45, %v434_v43  ;;  %v253_v49 = vpop.f32.mrb[5].mxu1  ;;  %v374_v52 = vadd.f32 %v451_v44, %v373_v50 }
  0xea   :  { %v254_v51 = vadd.f32 %v434_v43, %v253_v49  ;;  %461 = vst.msk [vmem:[%s804_s3 + $0x88] sm:$0xff] %vm43_vm0, %v379_v48 }
  0xeb   :  { %444 = vst.msk [vmem:[%s804_s3 + $0x48] sm:$0xff] %vm43_vm0, %v259_v47  ;;  %460 = vst.msk [vmem:[%s804_s3 + $0x80] sm:$0xff] %vm43_vm0, %v374_v52  ;;  %v557_v54 = vpop.f32.mrb[6].mxu0 }
  0xec   :  { %443 = vst.msk [vmem:[%s804_s3 + $0x40] sm:$0xff] %vm43_vm0, %v254_v51  ;;  %v537_v53 = vpop.f32.mrb[6].mxu1  ;;  %v389_v56 = vadd.f32 %v557_v54, %v451_v44  ;;  %v383_v58 = vpop.f32.mrb[7].mxu0 }
  0xed   :  { %v269_v55 = vadd.f32 %v537_v53, %v434_v43  ;;  %v263_v57 = vpop.f32.mrb[7].mxu1  ;;  %v384_v60 = vadd.f32 %v451_v44, %v383_v58 }
  0xee   :  { %v264_v59 = vadd.f32 %v434_v43, %v263_v57  ;;  %463 = vst.msk [vmem:[%s804_s3 + $0x98] sm:$0xff] %vm43_vm0, %v389_v56 }
  0xef   :  { %446 = vst.msk [vmem:[%s804_s3 + $0x58] sm:$0xff] %vm43_vm0, %v269_v55  ;;  %462 = vst.msk [vmem:[%s804_s3 + $0x90] sm:$0xff] %vm43_vm0, %v384_v60  ;;  %v560_v62 = vpop.f32.mrb[8].mxu0 }
  0xf0   :  { %445 = vst.msk [vmem:[%s804_s3 + $0x50] sm:$0xff] %vm43_vm0, %v264_v59  ;;  %v540_v61 = vpop.f32.mrb[8].mxu1  ;;  %v399_v0 = vadd.f32 %v560_v62, %v451_v44  ;;  %v393_v2 = vpop.f32.mrb[9].mxu0 }
  0xf1   :  { %v279_v63 = vadd.f32 %v540_v61, %v434_v43  ;;  %v273_v1 = vpop.f32.mrb[9].mxu1  ;;  %v394_v4 = vadd.f32 %v451_v44, %v393_v2 }
  0xf2   :  { %v274_v3 = vadd.f32 %v434_v43, %v273_v1  ;;  %465 = vst.msk [vmem:[%s804_s3 + $0xa8] sm:$0xff] %vm43_vm0, %v399_v0 }
  0xf3   :  { %448 = vst.msk [vmem:[%s804_s3 + $0x68] sm:$0xff] %vm43_vm0, %v279_v63  ;;  %464 = vst.msk [vmem:[%s804_s3 + $0xa0] sm:$0xff] %vm43_vm0, %v394_v4  ;;  %v563_v6 = vpop.f32.mrb[10].mxu0 }
  0xf4   :  { %447 = vst.msk [vmem:[%s804_s3 + $0x60] sm:$0xff] %vm43_vm0, %v274_v3  ;;  %v543_v5 = vpop.f32.mrb[10].mxu1  ;;  %v409_v8 = vadd.f32 %v563_v6, %v451_v44  ;;  %v403_v10 = vpop.f32.mrb[11].mxu0 }
  0xf5   :  { %v289_v7 = vadd.f32 %v543_v5, %v434_v43  ;;  %v283_v9 = vpop.f32.mrb[11].mxu1  ;;  %v404_v12 = vadd.f32 %v451_v44, %v403_v10 }
  0xf6   :  { %v284_v11 = vadd.f32 %v434_v43, %v283_v9  ;;  %467 = vst.msk [vmem:[%s804_s3 + $0xb8] sm:$0xff] %vm43_vm0, %v409_v8 }
  0xf7   :  { %450 = vst.msk [vmem:[%s804_s3 + $0x78] sm:$0xff] %vm43_vm0, %v289_v7  ;;  %466 = vst.msk [vmem:[%s804_s3 + $0xb0] sm:$0xff] %vm43_vm0, %v404_v12 }
  0xf8   :  { %449 = vst.msk [vmem:[%s804_s3 + $0x70] sm:$0xff] %vm43_vm0, %v284_v11 }

// kernel: seq2seq_forward.4
= control target key start
LH: loop header
LB: loop body
LE: loop exit
PB: predicated region body
PF: predicated region fallthrough
CT: control target
= control target key end

     0   :  { %s722_s12 = smov 0   ;;  %s724_s13 = smov 0   ;;  %s828_s0 = inlined_call_operand.vmem [shape: f32[3,8,8,32], index: 0, kind: input, shape index: {}]   ;;  %s829_s1 = inlined_call_operand.vmem [shape: f32[3,32,32], index: 1, kind: input, shape index: {}]   ;;  %s830_s2 = inlined_call_operand.vmem [shape: f32[3,1,32], index: 2, kind: input, shape index: {}]   ;;  %s831_s3 = inlined_call_operand.vmem [shape: f32[8,8,32], index: 3, kind: output, shape index: {}]  }
   0x1   :  { %s726_s14 = smov 0  }
   0x2 LB: > { %s735_s15 = sadd.s32 4294967295, %s696_s14   ;;  %s737_s16 = sadd.s32 1, %s696_s14   ;;  %s696_s14 = sphi %s726_s14, %s834_s14   ;;  %s692_s13 = sphi %s724_s13, %s833_s13   ;;  %s688_s12 = sphi %s722_s12, %s832_s12  }
   0x3   : > { %s17_s17 = ssub.s32 %s696_s14, %s737_s16  ;;  %s20_s18 = sadd.s32 1, %s692_s13 }
   0x4   : > { %p18_p0 = scmp.eq.s32.totalorder %s17_s17, 0  ;;  %p27_p1 = scmp.ne.s32.totalorder %s692_s13, %s688_s12 }
   0x5   : > { %p28_p2 = scmp.eq.s32.totalorder %s696_s14, 0  ;;  %p553_p4 = scmp.ge.s32.totalorder %s696_s14, 8 }
   0x6   : > { %s744_s19 = scalar_select %p18_p0, %s692_s13, %s20_s18  }
   0x7   : > { %p29_p3 = por %p28_p2, %p27_p1  ;;  %127 = sbr.rel (%p553_p4) target bundleno = 21 (0x15), region = 24 }
   0xe   : > { %130 = sbr.rel (!%p29_p3) target bundleno = 21 (0x15), region = 28  ;;  %s132_s20 = sand.u32 (%p29_p3), 1, %s692_s13  }
   0xf   : > { %s554_s21 = sshll.u32 (%p29_p3), %s696_s14, 3  ;;  %s634_s22 = smul.u32 (%p29_p3), 24, %s132_s20 }
  0x10   : > { %s136_s25 = scalar_lea.vmem (%p29_p3), %s828_s0, %s554_s21 }
  0x11   : > { %v168_v0 = vld [vmem:[%s136_s25] sm:$0xff] (%p29_p3)  ;;  %s134_s26 = scalar_lea.vmem (%p29_p3), [#allocation3], %s634_s22 }
  0x12   : > { %v170_v1 = vld [vmem:[%s136_s25 + $0x40] sm:$0xff] (%p29_p3)  ;;  %169 = vst [vmem:[%s134_s26] sm:$0xff] (%p29_p3), %v168_v0 }
  0x13   : > { %v172_v2 = vld [vmem:[%s136_s25 + $0x80] sm:$0xff] (%p29_p3)  ;;  %171 = vst [vmem:[%s134_s26 + $0x8] sm:$0xff] (%p29_p3), %v170_v1 }
  0x14   : > { %173 = vst [vmem:[%s134_s26 + $0x10] sm:$0xff] (%p29_p3), %v172_v2 }
  0x15 PF: > { %p555_p5 = scmp.ge.s32.totalorder %s696_s14, 1  ;;  %p178_p6 = scmp.lt.s32.totalorder %s696_s14, 9 }
  0x17   : > { %p179_p7 = pnand %p555_p5, %p178_p6 }
  0x18   : > { %s185_s27 = sand.u32 (!%p179_p7), 1, %s688_s12   ;;  %p207_p8 = scmp.lt.s32.totalorder (!%p179_p7), %s735_s15, 7 }
  0x19   : > { %182 = sbr.rel (%p179_p7) target bundleno = 312 (0x138), region = 66  ;;  %p557_p9 = scmp.ne.s32.totalorder (!%p179_p7), %s735_s15, 0 }
  0x1a   : > { %s635_s28 = smul.u32 (!%p179_p7), 24, %s185_s27 }
  0x1c   : > { %s758_s7 = scalar_lea.vmem (!%p179_p7), [#allocation3], %s635_s28 }
  0x20   : > { %s208_s29 = scalar_select %p207_p8, %s735_s15, 7 }
  0x21   : > { %214 = sbr.rel (%p557_p9) target bundleno = 40 (0x28), region = 74  ;;  %vm215_vm0 = vcmask (!%p557_p9), 261120   ;;  %v698_v3 = vmov (!%p557_p9), 0.0  }
  0x22   : > { %s556_s30 = sshll.u32 %s208_s29, 3  ;;  %216 = vst.msk [vmem:[#allocation2] sm:$0xff] (!%p557_p9), %vm215_vm0, %v698_v3 }
  0x23   : > { %s756_s6 = scalar_lea.vmem %s831_s3, %s556_s30 }
  0x28 PF: > { %v221_v4 = vld [vmem:[%s829_s1] sm:$0xff]  ;;  %v222_v5 = vld [vmem:[%s829_s1 + $0x8] sm:$0xff]  ;;  %v223_v6 = vld [vmem:[%s829_s1 + $0x10] sm:$0xff]  ;;  %v699_v7 = vmov 0.0|0.0   ;;  %vm700_vm1 = vmmov 0   ;;  %v701_v10 = vmov 0.0  }
  0x29   : > { %616 = vmatprep.subr.bf16.mxu0 %v699_v7  ;;  %v617_v8 = vpack.c.bf16 %v222_v5, %v221_v4  ;;  %v224_v9 = vld [vmem:[%s829_s1 + $0x18] sm:$0xff]  ;;  %591 = vmatprep.mubr.msk.f32.mxu0 %vm700_vm1, %v701_v10  ;;  %v225_v11 = vld [vmem:[%s829_s1 + $0x20] sm:$0xff]  ;;  %v226_v12 = vld [vmem:[%s829_s1 + $0x28] sm:$0xff]  ;;  %vm242_vm2 = vcmask 261120  }
  0x2a   : > { %622 = vmatprep.subr.bf16.mxu1 %v699_v7  ;;  %v227_v13 = vld [vmem:[%s829_s1 + $0x30] sm:$0xff]  ;;  %v228_v14 = vld [vmem:[%s829_s1 + $0x38] sm:$0xff]  ;;  %602 = vmatprep.mubr.msk.f32.mxu1 %vm700_vm1, %v701_v10  ;;  %v620_v15 = vpack.c.bf16 %v224_v9, %v223_v6  ;;  %v623_v16 = vpack.c.bf16 %v226_v12, %v225_v11  ;;  %v229_v17 = vld [vmem:[%s829_s1 + $0x40] sm:$0xff] }
  0x2b   : > { %618 = vmatpush3.bf16.msra.mxu0 %v617_v8  ;;  %v230_v18 = vld [vmem:[%s829_s1 + $0x48] sm:$0xff]  ;;  %v626_v19 = vpack.c.bf16 %v228_v14, %v227_v13  ;;  %v217_v20 = vld [vmem:[#allocation2] sm:$0xff]  ;;  %v231_v22 = vld [vmem:[%s829_s1 + $0x50] sm:$0xff] }
  0x2c   : > { %619 = vmatprep.subr.bf16.mxu0 %v699_v7  ;;  %624 = vmatpush3.bf16.msra.mxu1 %v623_v16  ;;  %v629_v21 = vpack.c.bf16 %v230_v18, %v229_v17  ;;  %v232_v23 = vld [vmem:[%s829_s1 + $0x58] sm:$0xff]  ;;  %v558_v25 = vld [vmem:[%s830_s2] ss:$0 sm:$0xff]  ;;  %v560_v28 = vld [vmem:[%s830_s2 + $0x1] ss:$0 sm:$0xff] }
  0x2d   : > { %625 = vmatprep.subr.bf16.mxu1 %v699_v7  ;;  %v632_v24 = vpack.c.bf16 %v232_v23, %v231_v22  ;;  %v218_v26 = vld [vmem:[%s758_s7] sm:$0xff]  ;;  %v219_v31 = vld [vmem:[%s758_s7 + $0x8] sm:$0xff]  ;;  %v220_v48 = vld [vmem:[%s758_s7 + $0x10] sm:$0xff] }
  0x2e   : > { %v562_v44 = vld [vmem:[%s830_s2 + $0x2] ss:$0 sm:$0xff] }
  0x2f   : > { %621 = vmatpush3.bf16.msra.mxu0 %v620_v15 }
  0x30   : > { %628 = vmatprep.subr.bf16.mxu0 %v699_v7  ;;  %627 = vmatpush3.bf16.msra.mxu1 %v626_v19 }
  0x32   : > { %592 = vmatmul.mubr.msk.f32.vlgmr.msra.gmra.mrb[0].mxu0 %vm242_vm2, %v217_v20 }
  0x33   : > { %630 = vmatpush3.bf16.msra.mxu0 %v629_v21  ;;  %613 = vmatprep.mubr.msk.f32.mxu0 %vm700_vm1, %v701_v10 }
  0x34   : > { %603 = vmatmul.mubr.msk.f32.vlgmr.msra.gmra.mrb[0].mxu1 %vm242_vm2, %v217_v20  ;;  %631 = vmatprep.subr.bf16.mxu0 %v699_v7 }
  0x37   : > { %633 = vmatpush3.bf16.msra.mxu0 %v632_v24 }
  0x3a   : > { %614 = vmatmul.mubr.msk.f32.vlgmr.msra.gmra.mrb[2].mxu0 %vm242_vm2, %v217_v20 }
 0x105   : > { %v312_v27 = vpop.f32.mrb[0].mxu0 }
 0x106   : > { %v313_v29 = vadd.f32 %v558_v25, %v312_v27  ;;  %v593_v30 = vpop.f32.mrb[1].mxu0 }
 0x107   : > { %v388_v32 = vpop.f32.mrb[0].mxu1 }
 0x108   : > { %v468_v33 = vadd.f32 %v313_v29, %v218_v26  ;;  %v389_v34 = vadd.f32 %v560_v28, %v388_v32  ;;  %v604_v35 = vpop.f32.mrb[1].mxu1 }
 0x10a   : > { %v564_v36 = vmul.f32 -1.442695, %v468_v33  ;;  %v475_v37 = vadd.f32 %v389_v34, %v219_v31 }
 0x10c   : > { %664 = vpow2.f32 %v564_v36  ;;  %v565_v38 = vmul.f32 -1.442695, %v475_v37 }
 0x10d   : > { %v464_v39 = vpop.f32.mrb[2].mxu0 }
 0x10e   : > { %v615_v40 = vpop.f32.mrb[3].mxu0  ;;  %666 = vpow2.f32 %v565_v38  ;;  %v465_v46 = vadd.f32 %v562_v44, %v464_v39 }
 0x116   : > { %v665_v41 = vpop.eup %664 }
 0x117   : > { %v472_v42 = vadd.f32 1.0, %v665_v41 }
 0x118   : > { %v667_v43 = vpop.eup %666 }
 0x119   : > { %668 = vrcp.f32 %v472_v42  ;;  %v479_v45 = vadd.f32 1.0, %v667_v43 }
 0x11b   : > { %670 = vrcp.f32 %v479_v45 }
 0x123   : > { %v669_v47 = vpop.eup %668 }
 0x124   : > { %v482_v49 = vmul.f32 %v669_v47, %v465_v46 }
 0x125   : > { %v671_v51 = vpop.eup %670 }
 0x126   : > { %v483_v50 = vadd.f32 %v482_v49, %v220_v48  ;;  %v485_v52 = vsub.f32 1.0, %v671_v51  ;;  %v487_v54 = vmul.f32 %v671_v51, %v217_v20 }
 0x128   : > { %672 = vtanh.f32 %v483_v50 }
 0x132   : > { %v673_v53 = vpop.eup %672 }
 0x133   : > { %v486_v55 = vmul.f32 %v673_v53, %v485_v52 }
 0x135   : > { %v488_v56 = vadd.f32 %v487_v54, %v486_v55 }
 0x137   : > { %489 = vst.msk [vmem:[#allocation2] sm:$0xff] %vm242_vm2, %v488_v56  ;;  %490 = vst.msk [vmem:[%s756_s6] sm:$0xff] %vm242_vm2, %v488_v56 }
 0x138 PF: > { %p10_p10 = scmp.ge.s32.totalorder %s737_s16, 10   ;;  %s832_s12 = smov %s692_s13 }
 0x139   : > { %s833_s13 = smov %s744_s19  ;;  %s834_s14 = smov %s737_s16 }
 0x13a   :  { %12 = sbr.rel (!%p10_p10) target bundleno = 2 (0x2), region = 109 }

// kernel: seq2seq_forward.5
= control target key start
LH: loop header
LB: loop body
LE: loop exit
PB: predicated region body
PF: predicated region fallthrough
CT: control target
= control target key end

     0   :  { %s4108_s0 = inlined_call_operand.vmem [shape: s32[7], index: 0, kind: input, shape index: {}]   ;;  %s4109_s1 = inlined_call_operand.vmem [shape: f32[7,8,16], index: 1, kind: input, shape index: {}]   ;;  %s4110_s2 = inlined_call_operand.vmem [shape: f32[8,8,32], index: 2, kind: input, shape index: {}]   ;;  %s4111_s3 = inlined_call_operand.vmem [shape: f32[128,16], index: 3, kind: input, shape index: {}]   ;;  %s4112_s4 = inlined_call_operand.vmem [shape: f32[3,16,32], index: 4, kind: input, shape index: {}]   ;;  %s4113_s5 = inlined_call_operand.vmem [shape: f32[3,32,32], index: 5, kind: input, shape index: {}]   ;;  %s4114_s6 = inlined_call_operand.vmem [shape: f32[3,32,32], index: 6, kind: input, shape index: {}]   ;;  %s4115_s7 = inlined_call_operand.vmem [shape: f32[2,1,32], index: 7, kind: input, shape index: {}]   ;;  %s4116_s8 = inlined_call_operand.vmem [shape: f32[2,1,32], index: 8, kind: input, shape index: {}]   ;;  %s4117_s9 = inlined_call_operand.vmem [shape: f32[32,32], index: 9, kind: input, shape index: {}]   ;;  %s4118_s10 = inlined_call_operand.vmem [shape: f32[1,32], index: 10, kind: input, shape index: {}]   ;;  %s4119_s11 = inlined_call_operand.vmem [shape: f32[32,128], index: 11, kind: input, shape index: {}]   ;;  %s4120_s12 = inlined_call_operand.vmem [shape: f32[32,128], index: 12, kind: input, shape index: {}]   ;;  %s4121_s13 = inlined_call_operand.vmem [shape: f32[1,128], index: 13, kind: input, shape index: {}]   ;;  %s4122_s14 = inlined_call_operand.vmem [shape: f32[7,8,128], index: 14, kind: output, shape index: {}]  }
   0x1   :  { %s19_s15 = sshll.u32 %s4108_s0, 4  ;;  %s20_s15 = int_to_ptr.vmem [resolvable:$true] %s19_s15 }
   0x2   :  { %s3538_s16 = scalar_lea.vmem %s20_s15, 16  ;;  %p3543_p1 = scmp.lt.s32.totalorder %s20_s15, %s20_s15 }
   0x3   :  { %p3539_p0 = scmp.ne.s32.totalorder %s20_s15, %s3538_s16  ;;  %p3544_p2 = scmp.lt.s32.totalorder %s3538_s16, %s3538_s16 }
   0x5   :  { %p3545_p3 = por %p3544_p2, %p3543_p1 }
   0x7   :  { %p3546_p4 = pnand %p3545_p3, %p3539_p0 }
   0x9   :  { %3549 = shalt.err (!%p3546_p4)  }
   0xa   :  { %s3560_s17 = smov [#allocation5]  }
   0xb   :  { %22 = dma.vmem_to_smem %s20_s15, 16, %s3560_s17, [#allocation4] }
   0xc   :  { %3554 = dma.done.wait [#allocation4], 16 }
   0xd   :  { %3555 = vsyncadd [#allocation4], 4294967280 }
   0xe   :  { %24 = sfence }
   0xf   :  { %s3647_s18 = smov 0  }
  0x10 LB: > { %s3653_s0 = sadd.s32 4294967295, %s3558_s18   ;;  %p2995_p5 = scmp.ge.s32.totalorder %s3558_s18, 1  ;;  %s3558_s18 = sphi %s3647_s18, %s30_s18  }
  0x11   : > { %p393_p6 = scmp.lt.s32.totalorder %s3558_s18, 8 }
  0x13   : > { %p394_p7 = pnand %p2995_p5, %p393_p6 }
  0x14   : > { %p435_p8 = scmp.lt.s32.totalorder (!%p394_p7), %s3653_s0, 6  ;;  %v3661_v0 = vld [vmem:[%s4110_s2] sm:$0xff] (!%p394_p7)  ;;  %v3666_v1 = vld [vmem:[%s4110_s2 + $0x8] sm:$0xff] (!%p394_p7)  ;;  %v3671_v2 = vld [vmem:[%s4110_s2 + $0x10] sm:$0xff] (!%p394_p7)  ;;  %p2998_p9 = scmp.ne.s32.totalorder (!%p394_p7), %s3653_s0, 0 }
  0x15   : > { %397 = sbr.rel (%p394_p7) target bundleno = 2177 (0x881), region = 72  ;;  %v3676_v3 = vld [vmem:[%s4110_s2 + $0x18] sm:$0xff] (!%p394_p7)  ;;  %v3681_v4 = vld [vmem:[%s4110_s2 + $0x20] sm:$0xff] (!%p394_p7)  ;;  %v3686_v5 = vld [vmem:[%s4110_s2 + $0x28] sm:$0xff] (!%p394_p7) }
  0x16   : > { %v3692_v6 = vld [vmem:[%s4110_s2 + $0x30] sm:$0xff] (!%p394_p7)  ;;  %v3697_v7 = vld [vmem:[%s4110_s2 + $0x38] sm:$0xff] (!%p394_p7) }
  0x1c   : > { %s436_s15 = scalar_select %p435_p8, %s3653_s0, 6 }
  0x1d   : > { %454 = sbr.rel (%p2998_p9) target bundleno = 266 (0x10a), region = 76  ;;  %v455_v8 = vld [vmem:[%s4117_s9] sm:$0xff] (!%p2998_p9)  ;;  %v456_v9 = vld [vmem:[%s4117_s9 + $0x8] sm:$0xff] (!%p2998_p9)  ;;  %v457_v10 = vld [vmem:[%s4117_s9 + $0x10] sm:$0xff] (!%p2998_p9)  ;;  %v3561_v11 = vmov (!%p2998_p9), 0.0|0.0   ;;  %vm3562_vm0 = vmmov (!%p2998_p9), 0  }
  0x1e   : > { %s2996_s21 = sshll.u32 %s436_s15, 3  ;;  %3385 = vmatprep.subr.bf16.mxu0 (!%p2998_p9), %v3561_v11  ;;  %v3386_v12 = vpack.c.bf16 (!%p2998_p9), %v456_v9, %v455_v8  ;;  %v458_v13 = vld [vmem:[%s4117_s9 + $0x18] sm:$0xff] (!%p2998_p9)  ;;  %v3563_v14 = vmov (!%p2998_p9), 0.0   ;;  %vm570_vm1 = vcmask (!%p2998_p9), 130048   ;;  %v474_v15 = vrot.slane (!%p2998_p9), %v3661_v0, 7 }
  0x1f   : > { %s3702_s24 = scalar_lea.vmem %s4109_s1, %s2996_s21  ;;  %s3707_s27 = scalar_lea.vmem %s4122_s14, %s2996_s21  ;;  %3158 = vmatprep.mubr.msk.f32.mxu0 (!%p2998_p9), %vm3562_vm0, %v3563_v14  ;;  %v475_v16 = vrot.slane (!%p2998_p9), %v3666_v1, 6  ;;  %v3389_v17 = vpack.c.bf16 (!%p2998_p9), %v458_v13, %v457_v10  ;;  %571 = vst.msk [vmem:[#allocation3] sm:$0xff] (!%p2998_p9), %vm570_vm1, %v3563_v14  ;;  %vm476_vm2 = vcmask (!%p2998_p9), 1041409   ;;  %v478_v18 = vrot.slane (!%p2998_p9), %v3671_v2, 5  ;;  %v2999_v30 = vld [vmem:[%s4118_s10] ss:$0 sm:$0xff] (!%p2998_p9) }
  0x20   : > { %vm479_vm3 = vcmask (!%p2998_p9), 1042434   ;;  %3387 = vmatpush3.bf16.msra.mxu0 (!%p2998_p9), %v3386_v12  ;;  %v481_v20 = vrot.slane (!%p2998_p9), %v3676_v3, 4  ;;  %vm482_vm4 = vcmask (!%p2998_p9), 1043459   ;;  %v484_v21 = vrot.slane (!%p2998_p9), %v3681_v4, 3 }
  0x21   : > { %v477_v19 = vsel (!%p2998_p9), %vm476_vm2, %v475_v16, %v474_v15  ;;  %3388 = vmatprep.subr.bf16.mxu0 (!%p2998_p9), %v3561_v11  ;;  %vm485_vm5 = vcmask (!%p2998_p9), 1044484   ;;  %v487_v23 = vrot.slane (!%p2998_p9), %v3686_v5, 2  ;;  %vm488_vm6 = vcmask (!%p2998_p9), 1045509  }
  0x22   : > { %v480_v22 = vsel (!%p2998_p9), %vm479_vm3, %v478_v18, %v477_v19  ;;  %v490_v25 = vrot.slane (!%p2998_p9), %v3692_v6, 1  ;;  %vm491_vm7 = vcmask (!%p2998_p9), 1046534   ;;  %vm493_vm8 = vcmask (!%p2998_p9), 1047559  }
  0x23   : > { %v483_v24 = vsel (!%p2998_p9), %vm482_vm4, %v481_v20, %v480_v22  ;;  %vm495_vm9 = vcmask (!%p2998_p9), 261120  }
  0x24   : > { %v486_v26 = vsel %vm485_vm5, %v484_v21, %v483_v24  ;;  %3390 = vmatpush3.bf16.msra.mxu0 %v3389_v17 }
  0x25   : > { %v489_v27 = vsel %vm488_vm6, %v487_v23, %v486_v26 }
  0x26   : > { %v492_v28 = vsel %vm491_vm7, %v490_v25, %v489_v27 }
  0x27   : > { %v494_v29 = vsel %vm493_vm8, %v3697_v7, %v492_v28 }
  0x28   : > { %3159 = vmatmul.mubr.msk.f32.vlgmr.msra.gmra.mrb[0].mxu0 %vm495_vm9, %v494_v29 }
  0xfb   : > { %v564_v31 = vpop.f32.mrb[0].mxu0 }
  0xfc   : > { %v565_v32 = vadd.f32 %v2999_v30, %v564_v31  ;;  %v3160_v33 = vpop.f32.mrb[1].mxu0 }
  0xfe   : > { %3489 = vtanh.f32 %v565_v32 }
 0x108   : > { %v3490_v34 = vpop.eup %3489 }
 0x109   : > { %569 = vst.msk [vmem:[#allocation2] sm:$0xff] %vm495_vm9, %v3490_v34 }
 0x10a PF: > { %vm635_vm10 = vcmask 261120   ;;  %v3564_v35 = vmov 0.0   ;;  %v3565_v36 = vmov 1966171168   ;;  %v590_v38 = vlaneseq  ;;  %s573_s28 = sld [smem:[#allocation5 + %s3653_s0]] }
 0x10b   : > { %3161 = vmatprep.subr.mxu1 %v3564_v35  ;;  %3171 = vmatprep.subr.mxu0 %v3564_v35  ;;  %v588_v37 = vunpack.c.l.s4 %v3565_v36  ;;  %vm3566_vm11 = vmmov 0   ;;  %vm1236_vm12 = vcmask 57344   ;;  %vm1325_vm13 = vcmask 64512  }
 0x10c   : > { %3162 = vmatpush3.xpose.msk.msra.mxu1 %vm635_vm10, %v3661_v0  ;;  %3163 = vmatprep.mubr.msk.f32.mxu1 %vm3566_vm11, %v3564_v35  ;;  %v591_v40 = vshrl.u32 %v590_v38, 7  ;;  %vm1953_vm14 = vcmask 1041409   ;;  %vm1956_vm15 = vcmask 1042434   ;;  %vm1959_vm0 = vcmask 1043459  }
 0x10d   : > { %3166 = vmatprep.subr.mxu1 %v3564_v35  ;;  %3172 = vmatpush3.xpose.msk.msra.mxu0 %vm635_vm10, %v3671_v2  ;;  %v589_v39 = vunpack.c.0.s8 %v588_v37  ;;  %vm1962_vm1 = vcmask 1044484   ;;  %vm1965_vm2 = vcmask 1045509   ;;  %vm1968_vm3 = vcmask 1046534  }
 0x10e   : > { %3173 = vmatprep.mubr.msk.f32.mxu0 %vm3566_vm11, %v3564_v35  ;;  %3181 = vmatprep.subr.mxu0 %v3564_v35  ;;  %vm1971_vm4 = vcmask 1047559   ;;  %vm2045_vm5 = vcmask 130048  }
 0x10f   : > { %v592_v42 = vsub.s32 %v589_v39, %v591_v40 }
 0x110   : > { %v3743_v41 = vld [vmem:[#allocation2] sm:$0xff]  ;;  %p574_p10 = scmp.eq.s32.totalorder %s573_s28, 1 }
 0x111   : > { %v586_v43 = vcombine.high %v3743_v41, %v3743_v41  ;;  %v593_v44 = vrot.slane %v3743_v41, %v592_v42 }
 0x112   : > { %s3878_s29 = scalar_select %p574_p10, 1, 0 }
 0x113   : > { %v601_v45 = vcombine.high %v593_v44, %v593_v44  ;;  %v609_v46 = vrot.slane %v593_v44, %v592_v42  ;;  %v600_v47 = vrot.slane %v586_v43, %v592_v42 }
 0x114   : > { %s576_s30 = scvt.s32.f32 %s3878_s29 }
 0x115   : > { %3164 = vmatmul.mubr.msk.f32.vlgmr.msra.gmra.mrb[0].mxu1 %vm635_vm10, %v609_v46  ;;  %v631_v48 = vcombine.high %v609_v46, %v609_v46  ;;  %v623_v49 = vrot.slane %v601_v45, %v592_v42  ;;  %v616_v50 = vrot.slane %v600_v47, %v592_v42  ;;  %v602_v52 = vcombine.high %v600_v47, %v600_v47 }
 0x116   : > { %3167 = vmatpush3.xpose.msk.msra.mxu1 %vm635_vm10, %v3666_v1  ;;  %3168 = vmatprep.mubr.msk.f32.mxu1 %vm3566_vm11, %v3564_v35  ;;  %s580_s0 = ssub.f32 1.0, %s576_s30 }
 0x117   : > { %3174 = vmatmul.mubr.msk.f32.vlgmr.msra.gmra.mrb[0].mxu0 %vm635_vm10, %v631_v48  ;;  %3176 = vmatprep.subr.mxu1 %v3564_v35  ;;  %v633_v51 = vcombine.high %v623_v49, %v623_v49  ;;  %v632_v53 = vcombine.high %v616_v50, %v616_v50  ;;  %v630_v54 = vrot.slane %v602_v52, %v592_v42 }
 0x118   : > { %3182 = vmatpush3.xpose.msk.msra.mxu0 %vm635_vm10, %v3681_v4  ;;  %3183 = vmatprep.mubr.msk.f32.mxu0 %vm3566_vm11, %v3564_v35 }
 0x119   : > { %3169 = vmatmul.mubr.msk.f32.vlgmr.msra.gmra.mrb[2].mxu1 %vm635_vm10, %v623_v49  ;;  %3191 = vmatprep.subr.mxu0 %v3564_v35  ;;  %v634_v55 = vcombine.high %v630_v54, %v630_v54 }
 0x11a   : > { %3177 = vmatpush3.xpose.msk.msra.mxu1 %vm635_vm10, %v3676_v3  ;;  %3178 = vmatprep.mubr.msk.f32.mxu1 %vm3566_vm11, %v3564_v35 }
 0x11b   : > { %3186 = vmatprep.subr.mxu1 %v3564_v35  ;;  %3184 = vmatmul.mubr.msk.f32.vlgmr.msra.gmra.mrb[2].mxu0 %vm635_vm10, %v616_v50 }
 0x11c   : > { %3192 = vmatpush3.xpose.msk.msra.mxu0 %vm635_vm10, %v3692_v6  ;;  %3193 = vmatprep.mubr.msk.f32.mxu0 %vm3566_vm11, %v3564_v35 }
 0x11d   : > { %3179 = vmatmul.mubr.msk.f32.vlgmr.msra.gmra.mrb[4].mxu1 %vm635_vm10, %v633_v51  ;;  %3201 = vmatprep.subr.mxu0 %v3564_v35 }
 0x11e   : > { %3187 = vmatpush3.xpose.msk.msra.mxu1 %vm635_vm10, %v3686_v5  ;;  %3188 = vmatprep.mubr.msk.f32.mxu1 %vm3566_vm11, %v3564_v35 }
 0x11f   : > { %3196 = vmatprep.subr.mxu1 %v3564_v35  ;;  %3194 = vmatmul.mubr.msk.f32.vlgmr.msra.gmra.mrb[4].mxu0 %vm635_vm10, %v632_v53 }
 0x120   : > { %3202 = vmatpush3.msra.mxu0 %v3661_v0  ;;  %3203 = vmatprep.mubr.msk.f32.mxu0 %vm3566_vm11, %v3564_v35 }
 0x121   : > { %3189 = vmatmul.mubr.msk.f32.vlgmr.msra.gmra.mrb[6].mxu1 %vm635_vm10, %v630_v54  ;;  %3211 = vmatprep.subr.mxu0 %v3564_v35 }
 0x122   : > { %3197 = vmatpush3.xpose.msk.msra.mxu1 %vm635_vm10, %v3697_v7  ;;  %3198 = vmatprep.mubr.msk.f32.mxu1 %vm3566_vm11, %v3564_v35 }
 0x123   : > { %3206 = vmatprep.subr.mxu1 %v3564_v35 }
 0x125   : > { %3199 = vmatmul.mubr.msk.f32.vlgmr.msra.gmra.mrb[8].mxu1 %vm635_vm10, %v634_v55 }
 0x126   : > { %3207 = vmatpush3.msra.mxu1 %v3666_v1  ;;  %3208 = vmatprep.mubr.msk.f32.mxu1 %vm3566_vm11, %v3564_v35 }
 0x127   : > { %3216 = vmatprep.subr.mxu1 %v3564_v35 }
 0x1e8   : > { %v707_v56 = vpop.f32.mrb[0].mxu1 }
 0x1e9   : > { %v3165_v57 = vpop.f32.mrb[1].mxu1  ;;  %v1237_v58 = vsel %vm1236_vm12, %v707_v56, -inf }
 0x1ea   : > { %1238 = vmax.xlane.f32.xlu0 %v1237_v58  ;;  %v857_v59 = vpop.f32.mrb[0].mxu0 }
 0x1eb   : > { %v1243_v60 = vsel %vm1236_vm12, %v857_v59, -inf  ;;  %v3175_v61 = vpop.f32.mrb[1].mxu0 }
 0x1ec   : > { %1244 = vmax.xlane.f32.xlu1 %v1243_v60  ;;  %v782_v62 = vpop.f32.mrb[2].mxu1 }
 0x1ed   : > { %v3170_v63 = vpop.f32.mrb[3].mxu1  ;;  %v1240_v0 = vsel %vm1236_vm12, %v782_v62, -inf }
 0x1ee   : > { %1241 = vmax.xlane.f32.xlu0 %v1240_v0  ;;  %v1007_v1 = vpop.f32.mrb[2].mxu0 }
 0x1ef   : > { %v1249_v8 = vsel %vm1236_vm12, %v1007_v1, -inf  ;;  %v3185_v9 = vpop.f32.mrb[3].mxu0 }
 0x1f0   : > { %v932_v10 = vpop.f32.mrb[4].mxu1 }
 0x1f1   : > { %v3180_v11 = vpop.f32.mrb[5].mxu1  ;;  %v1246_v12 = vsel %vm1236_vm12, %v932_v10, -inf }
 0x1f2   : > { %1247 = vmax.xlane.f32.xlu1 %v1246_v12  ;;  %1250 = vmax.xlane.f32.xlu0 %v1249_v8  ;;  %v1157_v13 = vpop.f32.mrb[4].mxu0 }
 0x1f3   : > { %v1255_v14 = vsel %vm1236_vm12, %v1157_v13, -inf  ;;  %v3195_v15 = vpop.f32.mrb[5].mxu0 }
 0x1f4   : > { %v1082_v16 = vpop.f32.mrb[6].mxu1 }
 0x1f5   : > { %v3190_v17 = vpop.f32.mrb[7].mxu1  ;;  %v1252_v18 = vsel %vm1236_vm12, %v1082_v16, -inf }
 0x1f6   : > { %1256 = vmax.xlane.f32.xlu0 %v1255_v14  ;;  %1253 = vmax.xlane.f32.xlu1 %v1252_v18 }
 0x1f8   : > { %v1232_v19 = vpop.f32.mrb[8].mxu1 }
 0x1f9   : > { %v3200_v20 = vpop.f32.mrb[9].mxu1  ;;  %v1258_v21 = vsel %vm1236_vm12, %v1232_v19, -inf }
 0x1fa   : > { %1259 = vmax.xlane.f32.xlu1 %v1258_v21 }
 0x277   : > { %v1239_v22 = vpop.xlane.xlu0 %1238 }
 0x278   : > { %v1261_v23 = vsub.f32 %v707_v56, %v1239_v22 }
 0x279   : > { %v1245_v24 = vpop.xlane.xlu1 %1244 }
 0x27a   : > { %v1269_v25 = vmul.f32 1.442695, %v1261_v23  ;;  %v1263_v26 = vsub.f32 %v857_v59, %v1245_v24 }
 0x27b   : > { %v1242_v27 = vpop.xlane.xlu0 %1241 }
 0x27c   : > { %3492 = vpow2.f32 %v1269_v25  ;;  %v1273_v28 = vmul.f32 1.442695, %v1263_v26  ;;  %v1262_v29 = vsub.f32 %v782_v62, %v1242_v27  ;;  %v1917_v27 = vld [vmem:[%s4113_s5 + $0x8] sm:$0xff] }
 0x27e   : > { %3494 = vpow2.f32 %v1273_v28  ;;  %v1271_v30 = vmul.f32 1.442695, %v1262_v29  ;;  %v1921_v29 = vld [vmem:[%s4113_s5 + $0x28] sm:$0xff] }
 0x27f   : > { %v1248_v31 = vpop.xlane.xlu1 %1247  ;;  %v1251_v32 = vpop.xlane.xlu0 %1250 }
 0x280   : > { %3496 = vpow2.f32 %v1271_v30  ;;  %v1264_v33 = vsub.f32 %v932_v10, %v1248_v31  ;;  %v1265_v34 = vsub.f32 %v1007_v1, %v1251_v32  ;;  %v3567_v30 = vmov 0.0|0.0   ;;  %v1918_v32 = vld [vmem:[%s4113_s5 + $0x10] sm:$0xff] }
 0x282   : > { %v1275_v36 = vmul.f32 1.442695, %v1264_v33  ;;  %v1277_v37 = vmul.f32 1.442695, %v1265_v34  ;;  %v1919_v33 = vld [vmem:[%s4113_s5 + $0x18] sm:$0xff]  ;;  %v1922_v34 = vld [vmem:[%s4113_s5 + $0x30] sm:$0xff] }
 0x283   : > { %v1257_v39 = vpop.xlane.xlu0 %1256  ;;  %v1254_v40 = vpop.xlane.xlu1 %1253 }
 0x284   : > { %3498 = vpow2.f32 %v1275_v36  ;;  %v1267_v42 = vsub.f32 %v1157_v13, %v1257_v39  ;;  %v1266_v43 = vsub.f32 %v1082_v16, %v1254_v40  ;;  %v3395_v36 = vpack.c.bf16 %v1919_v33, %v1918_v32  ;;  %v1912_v33 = vld [vmem:[%s4112_s4 + $0x10] sm:$0xff] }
 0x285   : > { %3500 = vpow2.f32 %v1277_v37  ;;  %v1923_v37 = vld [vmem:[%s4113_s5 + $0x38] sm:$0xff] }
 0x286   : > { %v3493_v44 = vpop.eup %3492  ;;  %v1281_v45 = vmul.f32 1.442695, %v1267_v42  ;;  %v1279_v46 = vmul.f32 1.442695, %v1266_v43  ;;  %v3410_v39 = vpack.c.bf16 %v1923_v37, %v1922_v34  ;;  %v1913_v34 = vld [vmem:[%s4112_s4 + $0x18] sm:$0xff]  ;;  %v2665_v37 = vld [vmem:[%s4120_s12 + $0x8] sm:$0xff] }
 0x287   : > { %v1260_v47 = vpop.xlane.xlu1 %1259  ;;  %v1285_v48 = vsel %vm1236_vm12, %v3493_v44, 0.0 }
 0x288   : > { %v3495_v49 = vpop.eup %3494  ;;  %3502 = vpow2.f32 %v1281_v45  ;;  %v1268_v50 = vsub.f32 %v1232_v19, %v1260_v47  ;;  %1286 = vadd.xlane.f32.xlu0 %v1285_v48 }
 0x289   : > { %3504 = vpow2.f32 %v1279_v46  ;;  %v1291_v53 = vsel %vm1236_vm12, %v3495_v49, 0.0 }
 0x28a   : > { %v3497_v51 = vpop.eup %3496  ;;  %v1283_v52 = vmul.f32 1.442695, %v1268_v50 }
 0x28b   : > { %v1288_v54 = vsel %vm1236_vm12, %v3497_v51, 0.0 }
 0x28c   : > { %3506 = vpow2.f32 %v1283_v52  ;;  %1292 = vadd.xlane.f32.xlu0 %v1291_v53  ;;  %1289 = vadd.xlane.f32.xlu1 %v1288_v54 }
 0x28e   : > { %v3499_v55 = vpop.eup %3498 }
 0x28f   : > { %v3501_v56 = vpop.eup %3500  ;;  %v1294_v57 = vsel %vm1236_vm12, %v3499_v55, 0.0 }
 0x290   : > { %v1297_v58 = vsel %vm1236_vm12, %v3501_v56, 0.0  ;;  %1295 = vadd.xlane.f32.xlu1 %v1294_v57 }
 0x291   : > { %1298 = vadd.xlane.f32.xlu0 %v1297_v58 }
 0x292   : > { %v3503_v59 = vpop.eup %3502 }
 0x293   : > { %v3505_v60 = vpop.eup %3504  ;;  %v1303_v61 = vsel %vm1236_vm12, %v3503_v59, 0.0 }
 0x294   : > { %v1300_v62 = vsel %vm1236_vm12, %v3505_v60, 0.0 }
 0x295   : > { %1304 = vadd.xlane.f32.xlu0 %v1303_v61  ;;  %1301 = vadd.xlane.f32.xlu1 %v1300_v62 }
 0x296   : > { %v3507_v63 = vpop.eup %3506 }
 0x297   : > { %v1306_v0 = vsel %vm1236_vm12, %v3507_v63, 0.0 }
 0x299   : > { %1307 = vadd.xlane.f32.xlu1 %v1306_v0 }
 0x315   : > { %v1287_v1 = vpop.xlane.xlu0 %1286 }
 0x316   : > { %3508 = vrcp.f32 %v1287_v1  ;;  %v1910_v1 = vld [vmem:[%s4112_s4] sm:$0xff] }
 0x319   : > { %v1293_v8 = vpop.xlane.xlu0 %1292  ;;  %v1290_v9 = vpop.xlane.xlu1 %1289 }
 0x31a   : > { %3510 = vrcp.f32 %v1293_v8  ;;  %v577_v8 = vld [vmem:[%s3702_s24] sm:$0xff] }
 0x31b   : > { %3512 = vrcp.f32 %v1290_v9  ;;  %v578_v9 = vstv %s576_s30 }
 0x31d   : > { %v1296_v10 = vpop.xlane.xlu1 %1295 }
 0x31e   : > { %v1299_v11 = vpop.xlane.xlu0 %1298  ;;  %3514 = vrcp.f32 %v1296_v10  ;;  %v581_v10 = vld [vmem:[#allocation3] sm:$0xff] }
 0x31f   : > { %3516 = vrcp.f32 %v1299_v11  ;;  %v582_v11 = vstv %s580_s0 }
 0x320   : > { %v3509_v12 = vpop.eup %3508 }
 0x321   : > { %v1317_v13 = vmul.f32 %v3509_v12, %v3493_v44  ;;  %v1911_v12 = vld [vmem:[%s4112_s4 + $0x8] sm:$0xff] }
 0x322   : > { %v1305_v14 = vpop.xlane.xlu0 %1304  ;;  %v1302_v15 = vpop.xlane.xlu1 %1301 }
 0x323   : > { %3518 = vrcp.f32 %v1305_v14  ;;  %3204 = vmatmul.mubr.msk.f32.vlgmr.msra.gmra.mrb[6].mxu0 %vm1325_vm13, %v1317_v13  ;;  %v1932_v13 = vld [vmem:[%s4114_s6 + $0x20] sm:$0xff]  ;;  %v1933_v14 = vld [vmem:[%s4114_s6 + $0x28] sm:$0xff] }
 0x324   : > { %v3511_v16 = vpop.eup %3510  ;;  %3520 = vrcp.f32 %v1302_v15  ;;  %3212 = vmatpush3.msra.mxu0 %v3671_v2  ;;  %3213 = vmatprep.mubr.msk.f32.mxu0 %vm3566_vm11, %v3564_v35 }
 0x325   : > { %v3513_v17 = vpop.eup %3512  ;;  %v1319_v18 = vmul.f32 %v3511_v16, %v3495_v49  ;;  %3221 = vmatprep.subr.mxu0 %v3564_v35 }
 0x326   : > { %v1318_v19 = vmul.f32 %v3513_v17, %v3497_v51  ;;  %v1308_v20 = vpop.xlane.xlu1 %1307 }
 0x327   : > { %3522 = vrcp.f32 %v1308_v20  ;;  %3214 = vmatmul.mubr.msk.f32.vlgmr.msra.gmra.mrb[8].mxu0 %vm1325_vm13, %v1319_v18  ;;  %v579_v18 = vmul.f32 %v578_v9, %v577_v8 }
 0x328   : > { %v3515_v21 = vpop.eup %3514  ;;  %3209 = vmatmul.mubr.msk.f32.vlgmr.msra.gmra.mrb[10].mxu1 %vm1325_vm13, %v1318_v19  ;;  %3222 = vmatpush3.msra.mxu0 %v3681_v4  ;;  %v583_v19 = vmul.f32 %v582_v11, %v581_v10 }
 0x329   : > { %v3517_v22 = vpop.eup %3516  ;;  %v1320_v23 = vmul.f32 %v3515_v21, %v3499_v55  ;;  %3217 = vmatpush3.msra.mxu1 %v3676_v3  ;;  %3218 = vmatprep.mubr.msk.f32.mxu1 %vm3566_vm11, %v3564_v35 }
 0x32a   : > { %v1321_v2 = vmul.f32 %v3517_v22, %v3501_v56  ;;  %3223 = vmatprep.mubr.msk.f32.mxu0 %vm3566_vm11, %v3564_v35  ;;  %3226 = vmatprep.subr.mxu1 %v3564_v35  ;;  %v3398_v22 = vpack.c.bf16 %v1911_v12, %v1910_v1 }
 0x32b   : > { %3231 = vmatprep.subr.mxu0 %v3564_v35 }
 0x32c   : > { %3219 = vmatmul.mubr.msk.f32.vlgmr.msra.gmra.mrb[12].mxu1 %vm1325_vm13, %v1320_v23  ;;  %3224 = vmatmul.mubr.msk.f32.vlgmr.msra.gmra.mrb[10].mxu0 %vm1325_vm13, %v1321_v2  ;;  %v3416_v23 = vpack.c.bf16 %v1933_v14, %v1932_v13  ;;  %v1928_v2 = vld [vmem:[%s4114_s6] sm:$0xff] }
 0x32d   : > { %v3519_v4 = vpop.eup %3518  ;;  %3227 = vmatpush3.msra.mxu1 %v3686_v5  ;;  %3228 = vmatprep.mubr.msk.f32.mxu1 %vm3566_vm11, %v3564_v35  ;;  %v3028_v13 = vld [vmem:[%s4115_s7] ss:$0 sm:$0xff] }
 0x32e   : > { %v3521_v3 = vpop.eup %3520  ;;  %v1323_v24 = vmul.f32 %v3519_v4, %v3503_v59  ;;  %3232 = vmatpush3.msra.mxu0 %v3692_v6  ;;  %3233 = vmatprep.mubr.msk.f32.mxu0 %vm3566_vm11, %v3564_v35  ;;  %v1916_v6 = vld [vmem:[%s4113_s5] sm:$0xff]  ;;  %v1929_v4 = vld [vmem:[%s4114_s6 + $0x8] sm:$0xff] }
 0x32f   : > { %v1322_v25 = vmul.f32 %v3521_v3, %v3505_v60  ;;  %3236 = vmatprep.subr.mxu1 %v3564_v35  ;;  %v3392_v28 = vpack.c.bf16 %v1917_v27, %v1916_v6  ;;  %3406 = vmatprep.subr.bf16.mxu0 %v3567_v30  ;;  %v1934_v3 = vld [vmem:[%s4114_s6 + $0x30] sm:$0xff] }
 0x330   : > { %3234 = vmatmul.mubr.msk.f32.vlgmr.msra.gmra.mrb[12].mxu0 %vm1325_vm13, %v1323_v24  ;;  %v1935_v24 = vld [vmem:[%s4114_s6 + $0x38] sm:$0xff]  ;;  %v1930_v27 = vld [vmem:[%s4114_s6 + $0x10] sm:$0xff] }
 0x331   : > { %v3523_v26 = vpop.eup %3522  ;;  %3229 = vmatmul.mubr.msk.f32.vlgmr.msra.gmra.mrb[14].mxu1 %vm1325_vm13, %v1322_v25  ;;  %3278 = vmatprep.mubr.msk.f32.mxu0 %vm3566_vm11, %v3564_v35  ;;  %v3419_v6 = vpack.c.bf16 %v1935_v24, %v1934_v3 }
 0x332   : > { %v1324_v5 = vmul.f32 %v3523_v26, %v3507_v63  ;;  %3237 = vmatpush3.msra.mxu1 %v3697_v7  ;;  %3238 = vmatprep.mubr.msk.f32.mxu1 %vm3566_vm11, %v3564_v35  ;;  %v1920_v7 = vld [vmem:[%s4113_s5 + $0x20] sm:$0xff]  ;;  %v584_v26 = vadd.f32 %v583_v19, %v579_v18 }
 0x333   : > { %3391 = vmatprep.subr.bf16.mxu1 %v3567_v30  ;;  %v3407_v31 = vpack.c.bf16 %v1921_v29, %v1920_v7  ;;  %v1931_v7 = vld [vmem:[%s4114_s6 + $0x18] sm:$0xff]  ;;  %v1915_v29 = vld [vmem:[%s4112_s4 + $0x28] sm:$0xff] }
 0x335   : > { %3239 = vmatmul.mubr.msk.f32.vlgmr.msra.gmra.mrb[16].mxu1 %vm1325_vm13, %v1324_v5  ;;  %3408 = vmatpush3.bf16.msra.mxu0 %v3407_v31  ;;  %v3401_v5 = vpack.c.bf16 %v1929_v4, %v1928_v2  ;;  %v3404_v31 = vpack.c.bf16 %v1931_v7, %v1930_v27  ;;  %v3033_v2 = vld [vmem:[%s4115_s7 + $0x1] ss:$0 sm:$0xff] }
 0x336   : > { %3249 = vmatprep.mubr.msk.f32.mxu1 %vm3566_vm11, %v3564_v35  ;;  %3393 = vmatpush3.bf16.msra.mxu1 %v3392_v28  ;;  %v1914_v28 = vld [vmem:[%s4112_s4 + $0x20] sm:$0xff] }
 0x337   : > { %3394 = vmatprep.subr.bf16.mxu1 %v3567_v30  ;;  %3409 = vmatprep.subr.bf16.mxu0 %v3567_v30  ;;  %v3428_v32 = vpack.c.bf16 %v1915_v29, %v1914_v28 }
 0x339   : > { %3411 = vmatpush3.bf16.msra.mxu0 %v3410_v39  ;;  %v3413_v39 = vpack.c.bf16 %v1913_v34, %v1912_v33  ;;  %v3038_v33 = vld [vmem:[%s4116_s8 + $0x1] ss:$0 sm:$0xff] }
 0x33a   : > { %3396 = vmatpush3.bf16.msra.mxu1 %v3395_v36  ;;  %3415 = vmatprep.subr.bf16.mxu0 %v3567_v30  ;;  %v2664_v36 = vld [vmem:[%s4120_s12] sm:$0xff] }
 0x33b   : > { %3397 = vmatprep.subr.bf16.mxu1 %v3567_v30 }
 0x3f6   : > { %v1395_v40 = vpop.f32.mrb[6].mxu0 }
 0x3f7   : > { %v3205_v42 = vpop.f32.mrb[7].mxu0 }
 0x3f8   : > { %v1924_v42 = vld [vmem:[%s4113_s5 + $0x40] sm:$0xff] }
 0x3fa   : > { %v1541_v43 = vpop.f32.mrb[8].mxu0 }
 0x3fb   : > { %v1468_v44 = vpop.f32.mrb[10].mxu1  ;;  %v1955_v45 = vrot.slane %v1541_v43, 6  ;;  %v3215_v46 = vpop.f32.mrb[9].mxu0  ;;  %v1925_v43 = vld [vmem:[%s4113_s5 + $0x48] sm:$0xff] }
 0x3fc   : > { %v1952_v47 = vrot.slane %v1468_v44, 7  ;;  %v3210_v48 = vpop.f32.mrb[11].mxu1  ;;  %v2666_v44 = vld [vmem:[%s4120_s12 + $0x10] sm:$0xff]  ;;  %v3422_v46 = vpack.c.bf16 %v1925_v43, %v1924_v42 }
 0x3fd   : > { %v1926_v48 = vld [vmem:[%s4113_s5 + $0x50] sm:$0xff] }
 0x3fe   : > { %v1954_v49 = vsel %vm1953_vm14, %v1952_v47, %v1395_v40  ;;  %v3437_v40 = vpack.c.bf16 %v2665_v37, %v2664_v36  ;;  %v3037_v37 = vld [vmem:[%s4116_s8] ss:$0 sm:$0xff] }
 0x3ff   : > { %v1957_v50 = vsel %vm1956_vm15, %v1955_v45, %v1954_v49  ;;  %v1614_v51 = vpop.f32.mrb[12].mxu1  ;;  %v1687_v52 = vpop.f32.mrb[10].mxu0  ;;  %v2667_v45 = vld [vmem:[%s4120_s12 + $0x18] sm:$0xff] }
 0x400   : > { %v1958_v53 = vrot.slane %v1614_v51, 5  ;;  %v1961_v54 = vrot.slane %v1687_v52, 4  ;;  %v3220_v55 = vpop.f32.mrb[13].mxu1  ;;  %v3225_v56 = vpop.f32.mrb[11].mxu0  ;;  %v3440_v47 = vpack.c.bf16 %v2667_v45, %v2666_v44  ;;  %v1927_v49 = vld [vmem:[%s4113_s5 + $0x58] sm:$0xff]  ;;  %v1936_v51 = vld [vmem:[%s4114_s6 + $0x40] sm:$0xff] }
 0x401   : > { %v1937_v52 = vld [vmem:[%s4114_s6 + $0x48] sm:$0xff]  ;;  %v1939_v55 = vld [vmem:[%s4114_s6 + $0x58] sm:$0xff] }
 0x402   : > { %v1960_v57 = vsel %vm1959_vm0, %v1958_v53, %v1957_v50  ;;  %v3425_v50 = vpack.c.bf16 %v1927_v49, %v1926_v48  ;;  %v3431_v53 = vpack.c.bf16 %v1937_v52, %v1936_v51  ;;  %v3042_v51 = vld [vmem:[%s4121_s13] ss:$0 sm:$0xff] }
 0x403   : > { %v1963_v58 = vsel %vm1962_vm1, %v1961_v54, %v1960_v57  ;;  %v1833_v59 = vpop.f32.mrb[12].mxu0  ;;  %v1938_v54 = vld [vmem:[%s4114_s6 + $0x50] sm:$0xff]  ;;  %v2660_v57 = vld [vmem:[%s4119_s11] sm:$0xff] }
 0x404   : > { %v1760_v60 = vpop.f32.mrb[14].mxu1  ;;  %v1967_v61 = vrot.slane %v1833_v59, 2  ;;  %v3235_v62 = vpop.f32.mrb[13].mxu0  ;;  %v3434_v56 = vpack.c.bf16 %v1939_v55, %v1938_v54  ;;  %v2662_v59 = vld [vmem:[%s4119_s11 + $0x10] sm:$0xff]  ;;  %v4044_v55 = vand.u32 127, %v590_v38  ;;  %v2852_v38 = vld [vmem:[%s4111_s3 + $0x8] sm:$0xff] }
 0x405   : > { %v1964_v63 = vrot.slane %v1760_v60, 3  ;;  %v3230_v0 = vpop.f32.mrb[15].mxu1 }
 0x407   : > { %v1966_v15 = vsel %vm1965_vm2, %v1964_v63, %v1963_v58  ;;  %v2661_v58 = vld [vmem:[%s4119_s11 + $0x8] sm:$0xff] }
 0x408   : > { %v1969_v16 = vsel %vm1968_vm3, %v1967_v61, %v1966_v15  ;;  %v1906_v17 = vpop.f32.mrb[16].mxu1  ;;  %v3443_v60 = vpack.c.bf16 %v2661_v58, %v2660_v57  ;;  %v2663_v61 = vld [vmem:[%s4119_s11 + $0x18] sm:$0xff] }
 0x409   : > { %v1970_v20 = vrot.slane %v1906_v17, 1  ;;  %v3240_v21 = vpop.f32.mrb[17].mxu1  ;;  %v3446_v62 = vpack.c.bf16 %v2663_v61, %v2662_v59 }
 0x40b   : > { %v3906_v25 = vsel %vm1971_vm4, %v1970_v20, %v1969_v16 }
 0x40c   : > { %3250 = vmatmul.mubr.msk.f32.vlgmr.msra.gmra.mrb[18].mxu1 %vm635_vm10, %v3906_v25  ;;  %3279 = vmatmul.mubr.msk.f32.vlgmr.msra.gmra.mrb[14].mxu0 %vm635_vm10, %v3906_v25 }
 0x40d   : > { %3399 = vmatpush3.bf16.msra.mxu1 %v3398_v22  ;;  %3417 = vmatpush3.bf16.msra.mxu0 %v3416_v23 }
 0x40e   : > { %3256 = vmatprep.mubr.msk.f32.mxu1 %vm3566_vm11, %v3564_v35  ;;  %3400 = vmatprep.subr.bf16.mxu1 %v3567_v30 }
 0x40f   : > { %3418 = vmatprep.subr.bf16.mxu0 %v3567_v30  ;;  %3296 = vmatprep.mubr.msk.f32.mxu0 %vm3566_vm11, %v3564_v35 }
 0x410   : > { %3257 = vmatmul.mubr.msk.f32.vlgmr.msra.gmra.mrb[20].mxu1 %vm2045_vm5, %v584_v26 }
 0x411   : > { %3402 = vmatpush3.bf16.msra.mxu1 %v3401_v5  ;;  %3420 = vmatpush3.bf16.msra.mxu0 %v3419_v6 }
 0x412   : > { %3403 = vmatprep.subr.bf16.mxu1 %v3567_v30  ;;  %3427 = vmatprep.subr.bf16.mxu0 %v3567_v30 }
 0x413   : > { %3267 = vmatprep.mubr.msk.f32.mxu1 %vm3566_vm11, %v3564_v35 }
 0x414   : > { %3297 = vmatmul.mubr.msk.f32.vlgmr.msra.gmra.mrb[16].mxu0 %vm635_vm10, %v3743_v41 }
 0x415   : > { %3405 = vmatpush3.bf16.msra.mxu1 %v3404_v31  ;;  %3429 = vmatpush3.bf16.msra.mxu0 %v3428_v32 }
 0x416   : > { %3412 = vmatprep.subr.bf16.mxu1 %v3567_v30  ;;  %3314 = vmatprep.mubr.msk.f32.mxu0 %vm3566_vm11, %v3564_v35 }
 0x417   : > { %3436 = vmatprep.subr.bf16.mxu0 %v3567_v30 }
 0x418   : > { %3268 = vmatmul.mubr.msk.f32.vlgmr.msra.gmra.mrb[22].mxu1 %vm635_vm10, %v3743_v41  ;;  %3315 = vmatmul.mubr.msk.f32.vlgmr.msra.gmra.mrb[18].mxu0 %vm2045_vm5, %v584_v26 }
 0x419   : > { %3414 = vmatpush3.bf16.msra.mxu1 %v3413_v39  ;;  %3438 = vmatpush3.bf16.msra.mxu0 %v3437_v40 }
 0x41a   : > { %3285 = vmatprep.mubr.msk.f32.mxu1 %vm3566_vm11, %v3564_v35  ;;  %3421 = vmatprep.subr.bf16.mxu1 %v3567_v30 }
 0x41b   : > { %3439 = vmatprep.subr.bf16.mxu0 %v3567_v30  ;;  %3336 = vmatprep.mubr.msk.f32.mxu0 %vm3566_vm11, %v3564_v35 }
 0x41c   : > { %3286 = vmatmul.mubr.msk.f32.vlgmr.msra.gmra.mrb[24].mxu1 %vm2045_vm5, %v584_v26 }
 0x41d   : > { %3423 = vmatpush3.bf16.msra.mxu1 %v3422_v46  ;;  %3441 = vmatpush3.bf16.msra.mxu0 %v3440_v47 }
 0x41e   : > { %3424 = vmatprep.subr.bf16.mxu1 %v3567_v30  ;;  %3307 = vmatprep.mubr.msk.f32.mxu1 %vm3566_vm11, %v3564_v35 }
 0x41f   : > { %3448 = vmatprep.subr.bf16.mxu0 %v3567_v30 }
 0x420   : > { %3337 = vmatmul.mubr.msk.f32.vlgmr.msra.gmra.mrb[20].mxu0 %vm635_vm10, %v3906_v25 }
 0x421   : > { %3426 = vmatpush3.bf16.msra.mxu1 %v3425_v50  ;;  %3382 = vmatprep.mubr.msk.f32.mxu0 %vm3566_vm11, %v3564_v35 }
 0x422   : > { %3430 = vmatprep.subr.bf16.mxu1 %v3567_v30 }
 0x424   : > { %3308 = vmatmul.mubr.msk.f32.vlgmr.msra.gmra.mrb[26].mxu1 %vm635_vm10, %v3906_v25 }
 0x425   : > { %3432 = vmatpush3.bf16.msra.mxu1 %v3431_v53  ;;  %3325 = vmatprep.mubr.msk.f32.mxu1 %vm3566_vm11, %v3564_v35 }
 0x426   : > { %3433 = vmatprep.subr.bf16.mxu1 %v3567_v30 }
 0x429   : > { %3435 = vmatpush3.bf16.msra.mxu1 %v3434_v56 }
 0x42a   : > { %3442 = vmatprep.subr.bf16.mxu1 %v3567_v30 }
 0x42c   : > { %3326 = vmatmul.mubr.msk.f32.vlgmr.msra.gmra.mrb[28].mxu1 %vm635_vm10, %v3743_v41 }
 0x42d   : > { %3347 = vmatprep.mubr.msk.f32.mxu1 %vm3566_vm11, %v3564_v35  ;;  %3444 = vmatpush3.bf16.msra.mxu1 %v3443_v60 }
 0x42e   : > { %3445 = vmatprep.subr.bf16.mxu1 %v3567_v30 }
 0x431   : > { %3447 = vmatpush3.bf16.msra.mxu1 %v3446_v62  ;;  %v2851_v62 = vld [vmem:[%s4111_s3] sm:$0xff] }
 0x4df   : > { %v2041_v35 = vpop.f32.mrb[18].mxu1  ;;  %v2271_v63 = vpop.f32.mrb[14].mxu0 }
 0x4e0   : > { %v3251_v0 = vpop.f32.mrb[19].mxu1  ;;  %v3280_v1 = vpop.f32.mrb[15].mxu0 }
 0x4e1   : > { %v2854_v0 = vld [vmem:[%s4111_s3 + $0x18] sm:$0xff] }
 0x4e3   : > { %v2115_v8 = vpop.f32.mrb[20].mxu1 }
 0x4e4   : > { %v2116_v9 = vadd.f32 %v2115_v8, %v2041_v35  ;;  %v3258_v10 = vpop.f32.mrb[21].mxu1  ;;  %v2853_v35 = vld [vmem:[%s4111_s3 + $0x10] sm:$0xff]  ;;  %v2855_v8 = vld [vmem:[%s4111_s3 + $0x20] sm:$0xff] }
 0x4e5   : > { %v3452_v1 = vpack.c.bf16 %v2854_v0, %v2853_v35 }
 0x4e7   : > { %v2411_v11 = vpop.f32.mrb[16].mxu0 }
 0x4e8   : > { %v3298_v12 = vpop.f32.mrb[17].mxu0 }
 0x4e9   : > { %v2858_v12 = vld [vmem:[%s4111_s3 + $0x38] sm:$0xff] }
 0x4eb   : > { %v2187_v14 = vpop.f32.mrb[22].mxu1  ;;  %v2565_v15 = vpop.f32.mrb[18].mxu0 }
 0x4ec   : > { %v2191_v16 = vadd.f32 %v2187_v14, %v2116_v9  ;;  %v3269_v17 = vpop.f32.mrb[23].mxu1  ;;  %v3316_v18 = vpop.f32.mrb[19].mxu0  ;;  %v2856_v9 = vld [vmem:[%s4111_s3 + $0x28] sm:$0xff]  ;;  %v2859_v14 = vld [vmem:[%s4111_s3 + $0x40] sm:$0xff] }
 0x4ed   : > { %v3455_v10 = vpack.c.bf16 %v2856_v9, %v2855_v8  ;;  %v2861_v17 = vld [vmem:[%s4111_s3 + $0x50] sm:$0xff]  ;;  %v2862_v18 = vld [vmem:[%s4111_s3 + $0x58] sm:$0xff] }
 0x4ee   : > { %v2198_v19 = vadd.f32 %v3028_v13, %v2191_v16 }
 0x4ef   : > { %v2341_v20 = vpop.f32.mrb[24].mxu1 }
 0x4f0   : > { %v3029_v21 = vmul.f32 -1.442695, %v2198_v19  ;;  %v2342_v22 = vadd.f32 %v2341_v20, %v2271_v63  ;;  %v3287_v23 = vpop.f32.mrb[25].mxu1  ;;  %v3449_v63 = vpack.c.bf16 %v2852_v38, %v2851_v62  ;;  %v3464_v19 = vpack.c.bf16 %v2862_v18, %v2861_v17  ;;  %v2863_v20 = vld [vmem:[%s4111_s3 + $0x60] sm:$0xff] }
 0x4f2   : > { %3524 = vpow2.f32 %v3029_v21  ;;  %v2415_v4 = vadd.f32 %v2411_v11, %v2342_v22  ;;  %3450 = vmatpush3.bf16.msra.mxu0 %v3449_v63  ;;  %v2857_v11 = vld [vmem:[%s4111_s3 + $0x30] sm:$0xff]  ;;  %v2864_v21 = vld [vmem:[%s4111_s3 + $0x68] sm:$0xff] }
 0x4f3   : > { %v2734_v3 = vpop.f32.mrb[20].mxu0  ;;  %3451 = vmatprep.subr.bf16.mxu0 %v3567_v30  ;;  %v3458_v13 = vpack.c.bf16 %v2858_v12, %v2857_v11  ;;  %v3467_v22 = vpack.c.bf16 %v2864_v21, %v2863_v20 }
 0x4f4   : > { %v2422_v24 = vadd.f32 %v3033_v2, %v2415_v4  ;;  %v3338_v25 = vpop.f32.mrb[21].mxu0 }
 0x4f5   : > { %v2865_v25 = vld [vmem:[%s4111_s3 + $0x70] sm:$0xff] }
 0x4f6   : > { %v3034_v26 = vmul.f32 -1.442695, %v2422_v24  ;;  %3453 = vmatpush3.bf16.msra.mxu0 %v3452_v1 }
 0x4f7   : > { %v2495_v5 = vpop.f32.mrb[26].mxu1  ;;  %3454 = vmatprep.subr.bf16.mxu0 %v3567_v30 }
 0x4f8   : > { %v2566_v6 = vadd.f32 %v2565_v15, %v2495_v5  ;;  %v3309_v27 = vpop.f32.mrb[27].mxu1  ;;  %3526 = vpow2.f32 %v3034_v26  ;;  %v2860_v15 = vld [vmem:[%s4111_s3 + $0x48] sm:$0xff]  ;;  %v2866_v26 = vld [vmem:[%s4111_s3 + $0x78] sm:$0xff] }
 0x4f9   : > { %v3461_v16 = vpack.c.bf16 %v2860_v15, %v2859_v14  ;;  %v3470_v5 = vpack.c.bf16 %v2866_v26, %v2865_v25 }
 0x4fa   : > { %v2575_v40 = vadd.f32 %v3037_v37, %v2566_v6  ;;  %3456 = vmatpush3.bf16.msra.mxu0 %v3455_v10 }
 0x4fb   : > { %3457 = vmatprep.subr.bf16.mxu0 %v3567_v30 }
 0x4fc   : > { %v3525_v7 = vpop.eup %3524 }
 0x4fd   : > { %v2202_v28 = vadd.f32 1.0, %v3525_v7 }
 0x4fe   : > { %3459 = vmatpush3.bf16.msra.mxu0 %v3458_v13 }
 0x4ff   : > { %3528 = vrcp.f32 %v2202_v28  ;;  %v2648_v29 = vpop.f32.mrb[28].mxu1  ;;  %3460 = vmatprep.subr.bf16.mxu0 %v3567_v30 }
 0x500   : > { %v3327_v31 = vpop.f32.mrb[29].mxu1  ;;  %v2649_v36 = vadd.f32 %v3038_v33, %v2648_v29  ;;  %v3568_v33 = vmov 1.0  }
 0x502   : > { %v3527_v32 = vpop.eup %3526  ;;  %3462 = vmatpush3.bf16.msra.mxu0 %v3461_v16 }
 0x503   : > { %v2426_v34 = vadd.f32 1.0, %v3527_v32  ;;  %3463 = vmatprep.subr.bf16.mxu0 %v3567_v30 }
 0x505   : > { %3530 = vrcp.f32 %v2426_v34 }
 0x506   : > { %3465 = vmatpush3.bf16.msra.mxu0 %v3464_v19 }
 0x507   : > { %3466 = vmatprep.subr.bf16.mxu0 %v3567_v30 }
 0x509   : > { %v3529_v39 = vpop.eup %3528 }
 0x50a   : > { %v2652_v42 = vmul.f32 %v3529_v39, %v2649_v36  ;;  %3468 = vmatpush3.bf16.msra.mxu0 %v3467_v22 }
 0x50b   : > { %3469 = vmatprep.subr.bf16.mxu0 %v3567_v30 }
 0x50c   : > { %v2653_v43 = vadd.f32 %v2652_v42, %v2575_v40 }
 0x50e   : > { %3532 = vtanh.f32 %v2653_v43  ;;  %3471 = vmatpush3.bf16.msra.mxu0 %v3470_v5 }
 0x50f   : > { %v3531_v44 = vpop.eup %3530 }
 0x510   : > { %v2655_v45 = vsub.f32 1.0, %v3531_v44  ;;  %v2657_v48 = vmul.f32 %v3531_v44, %v3743_v41 }
 0x518   : > { %v3533_v46 = vpop.eup %3532 }
 0x519   : > { %v2656_v47 = vmul.f32 %v3533_v46, %v2655_v45 }
 0x51b   : > { %v2658_v49 = vadd.f32 %v2657_v48, %v2656_v47 }
 0x51d   : > { %2659 = vst.msk [vmem:[#allocation2] sm:$0xff] %vm635_vm10, %v2658_v49  ;;  %3348 = vmatmul.mubr.msk.f32.vlgmr.msra.gmra.mrb[30].mxu1 %vm635_vm10, %v2658_v49 }
 0x5f0   : > { %v2807_v50 = vpop.f32.mrb[30].mxu1 }
 0x5f1   : > { %v2808_v52 = vadd.f32 %v2807_v50, %v2734_v3  ;;  %v3349_v53 = vpop.f32.mrb[31].mxu1 }
 0x5f3   : > { %v2818_v54 = vadd.f32 %v3042_v51, %v2808_v52 }
 0x5f5   : > { %2819 = vmax.xlane.f32.xlu0 %v2818_v54 }
 0x682   : > { %v2820_v56 = vpop.xlane.xlu0 %2819 }
 0x683   : > { %v2821_v57 = vsub.f32 %v2818_v54, %v2820_v56  ;;  %vm2832_vm6 = vcmp.eq.f32.partialorder %v2818_v54, %v2820_v56 }
 0x684   : > { %v2833_v41 = vsel %vm2832_vm6, %v4044_v55, 128 }
 0x685   : > { %v2822_v58 = vmul.f32 1.442695, %v2821_v57  ;;  %v2835_v59 = vshra.s32 %v2833_v41, 16  ;;  %v2834_v23 = vand.u32 65535, %v2833_v41 }
 0x687   : > { %3534 = vpow2.f32 %v2822_v58  ;;  %v2837_v60 = vcvt.s32.f32 %v2835_v59  ;;  %v2836_v4 = vcvt.s32.f32 %v2834_v23 }
 0x689   : > { %2838 = vmin.xlane.f32.xlu1 %v2837_v60 }
 0x691   : > { %v3535_v61 = vpop.eup %3534 }
 0x692   : > { %2824 = vadd.xlane.f32.xlu1 %v3535_v61 }
 0x716   : > { %v2839_v2 = vpop.xlane.xlu1 %2838 }
 0x717   : > { %vm2840_vm7 = vcmp.eq.f32.partialorder %v2837_v60, %v2839_v2  ;;  %v2845_v7 = vcvt.f32.s32 %v2839_v2 }
 0x718   : > { %v2841_v3 = vsel %vm2840_vm7, %v2836_v4, inf }
 0x719   : > { %2842 = vmin.xlane.f32.xlu0 %v2841_v3  ;;  %v2846_v29 = vshll.u32 %v2845_v7, 16 }
 0x71f   : > { %v2825_v24 = vpop.xlane.xlu1 %2824 }
 0x720   : > { %3536 = vlog2.f32 %v2825_v24 }
 0x72a   : > { %v3537_v30 = vpop.eup %3536 }
 0x72b   : > { %v2827_v6 = vmul.f32 0.6931472, %v3537_v30 }
 0x72d   : > { %v2828_v27 = vsub.f32 %v2821_v57, %v2827_v6 }
 0x72f   : > { %2829 = vst [vmem:[%s3707_s27] sm:$0xff] %v2828_v27 }
 0x7a6   : > { %v2843_v28 = vpop.xlane.xlu0 %2842 }
 0x7a7   : > { %v2844_v31 = vcvt.f32.s32 %v2843_v28 }
 0x7a9   : > { %v2847_v32 = vadd.s32 %v2846_v29, %v2844_v31 }
 0x7ab   : > { %vm2848_vm8 = vcmp.eq.s32.totalorder %v4044_v55, %v2847_v32 }
 0x7ac   : > { %3383 = vmatmul.mubr.msk.f32.vlgmr.msra.gmra.mrb[22].mxu0 %vm2848_vm8, %v3568_v33 }
 0x87f   : > { %v2933_v34 = vpop.f32.mrb[22].mxu0 }
 0x880   : > { %2937 = vst.msk [vmem:[#allocation3] sm:$0xff] %vm2045_vm5, %v2933_v34  ;;  %v3384_v36 = vpop.f32.mrb[23].mxu0 }
 0x881 PF: > { %s30_s18 = sadd.s32 1, %s3558_s18  }
 0x882   : > { %p27_p11 = scmp.ge.s32.totalorder %s30_s18, 9  }
 0x884   :  { %29 = sbr.rel (!%p27_p11) target bundleno = 16 (0x10), region = 106 }

</bundles_post_ra>
